<compile_context>
chip_gen: v5e
topology: v5e:2x2
jax: 0.10.0
libtpu: 0.0.40
codegen_flags: <defaults>
</compile_context>

<pallas_src>
import functools

import jax
import jax.numpy as jnp
from jax import lax
from jax.experimental import pallas as pl
from jax.experimental.pallas import tpu as pltpu


def _attn_kernel(x_ref, fl_ref, wq_ref, wk_ref, wv_ref, wp_ref, bp_ref, o_ref,
                 kh_ref, vh_ref, *, num_heads, head_dim):
    """One grid step == one (batch, query-tile) pair.

    x_ref  : (1, TN, C)   query-side tokens
    fl_ref : (1, M,  C)   key/value-side tokens (constant across the tile axis)
    wq_ref : (C, C)       q projection (in, out) -- pre-scaled by head_dim**-0.5
    wk_ref : (C, C)       k projection (in, out)
    wv_ref : (C, C)       v projection (in, out)
    wp_ref : (C, C)       output projection (in, out)
    bp_ref : (1, C)       output projection bias
    o_ref  : (1, TN, C)   output
    kh_ref : (H, M, D)    VMEM scratch -- per-batch key heads (carried across tiles)
    vh_ref : (H, M, D)    VMEM scratch -- per-batch value heads (carried across tiles)
    """
    H, D = num_heads, head_dim

    # K/V projection + head split only once per batch (query-tile axis is "arbitrary",
    # so it iterates sequentially on one core and the scratch carry is valid).
    @pl.when(pl.program_id(1) == 0)
    def _():
        f = fl_ref[0]                                   # (M, C), model dtype
        M = f.shape[0]
        fdt = f.dtype
        k = jnp.dot(f, wk_ref[...], preferred_element_type=fdt)   # (M, C)
        v = jnp.dot(f, wv_ref[...], preferred_element_type=fdt)   # (M, C)
        kh_ref[...] = jnp.transpose(k.reshape(M, H, D), (1, 0, 2))  # (H, M, D)
        vh_ref[...] = jnp.transpose(v.reshape(M, H, D), (1, 0, 2))  # (H, M, D)

    x = x_ref[0]                                        # (TN, C)
    TN = x.shape[0]
    cdt = x.dtype

    # q projection (scale already folded into wq in the wrapper), stays in model dtype.
    q = jnp.dot(x, wq_ref[...], preferred_element_type=cdt)        # (TN, C)
    qh = jnp.transpose(q.reshape(TN, H, D), (1, 0, 2))             # (H, TN, D)

    # Scores for all heads in one batched MXU op; k consumed in its stored layout.
    s = lax.dot_general(qh, kh_ref[...], (((2,), (2,)), ((0,), (0,))),
                        preferred_element_type=jnp.float32)        # (H, TN, M) f32

    # Numerically-stable softmax in f32; reciprocal goes to the EUP slot.
    s = s - jnp.max(s, axis=-1, keepdims=True)
    p = jnp.exp(s)
    p = p * pl.reciprocal(jnp.sum(p, axis=-1, keepdims=True), approx=True)

    # attn @ v, batched over heads.
    o = lax.dot_general(p.astype(cdt), vh_ref[...], (((2,), (1,)), ((0,), (0,))),
                        preferred_element_type=cdt)                # (H, TN, D)

    # One (H,TN,D)->(TN,C) relayout, then a single dense MXU matmul for the output proj.
    o2 = jnp.transpose(o, (1, 0, 2)).reshape(TN, H * D)            # (TN, C)
    out = jnp.dot(o2, wp_ref[...], preferred_element_type=jnp.float32)
    out = out + bp_ref[...].astype(jnp.float32)                    # (TN, C)

    o_ref[0] = out.astype(o_ref.dtype)   # single dense (TN, C) store per step


def _round_up(x, m):
    return ((x + m - 1) // m) * m


def _vmem_capacity_bytes():
    """Physical VMEM of the attached TPU generation (fallback: 64 MiB, v7x-safe)."""
    try:
        return int(pltpu.get_tpu_info().vmem_capacity_bytes)
    except Exception:
        return 64 * 1024 * 1024


def _vmem_estimate(tn, m, c, h, d, act_itemsize, w_itemsize):
    """Tight-ish estimate of in-kernel VMEM use (bytes), +25% headroom."""
    dbl = 2  # default double-buffered pipeline copies
    io = dbl * 2 * tn * c * act_itemsize                         # x + o tiles
    const = dbl * (m * c * act_itemsize                          # fl
                   + (4 * c * c + c) * w_itemsize)               # wq/wk/wv/wp + bias
    scratch = 2 * h * m * d * act_itemsize                       # kh + vh scratch
    interm = 4 * (2 * tn * c                                     # q / qh
                  + 2 * h * tn * m                               # scores + probs (f32)
                  + 2 * h * tn * d                               # o, o2
                  + tn * c                                       # out (f32)
                  + 4 * m * c)                                   # k/v temporaries at t==0
    return int((io + const + scratch + interm) * 1.25)


def _auto_tile(n, m, c, h, d, act_itemsize, w_itemsize, budget, vmem_cap):
    """Pick (query_tile, padded_N): 128-aligned tiles, bigger targets on 128 MiB parts."""
    min_sub = 16 if act_itemsize < 4 else 8        # bf16 sublane packing
    target = 1024 if vmem_cap >= (100 << 20) else 512
    while True:
        if n <= target:
            tn = _round_up(n, min_sub)
            n_pad = tn
        else:
            n_pad = _round_up(n, 128)
            tn = 128
            t = 128
            while t <= target:
                if n_pad % t == 0:
                    tn = t
                t += 128
        if _vmem_estimate(tn, m, c, h, d, act_itemsize, w_itemsize) <= budget \
                or target <= 128:
            return tn, n_pad
        target //= 2


def pvt_attention(x, fl, params, *, num_heads, q_tile=None):
    """Pallas-backed PVT Attention forward (q from x, k/v from fl; dropout = identity).

    x  : (B, N, C)   query tokens
    fl : (B, M, C)   key/value tokens (spatially-reduced sequence)
    params: 'wq' (C,C), 'wk' (C,C), 'wv' (C,C), 'wp' (C,C), 'bp' (C,)
            (Linear weights pre-transposed to (in, out), i.e. y = x @ W + b.)
    """
    B, N, C = x.shape
    _, M, _ = fl.shape
    assert C % num_heads == 0
    H = num_heads
    D = C // H
    scale = D ** (-0.5)

    act_it = jnp.dtype(x.dtype).itemsize
    w_it = jnp.dtype(params["wq"].dtype).itemsize

    vmem_cap = _vmem_capacity_bytes()
    budget = int(vmem_cap * 0.8)   # never request the whole VMEM (v7x: 64 MiB total)

    if q_tile is not None:
        TN = int(q_tile)
        assert TN == N or TN % 8 == 0, "query tile must be a multiple of 8 (or full N)"
        N_pad = _round_up(N, TN)
    else:
        TN, N_pad = _auto_tile(N, M, C, H, D, act_it, w_it, budget, vmem_cap)

    vmem_limit = int(min(max(_vmem_estimate(TN, M, C, H, D, act_it, w_it), 8 << 20),
                         budget))

    # Pad awkward N with zero query rows (sliced off below); softmax per query row is
    # independent of other rows, so padding never perturbs valid outputs.
    x_in = x if N_pad == N else jnp.pad(x, ((0, 0), (0, N_pad - N), (0, 0)))

    # Fold the attention scale into the q projection weight (zero in-kernel VPU cost).
    wq = params["wq"] * scale                    # (C, C)
    wk = params["wk"]                            # (C, C)
    wv = params["wv"]                            # (C, C)
    wp = params["wp"]                            # (C, C)
    bp = params["bp"].reshape(1, C)

    kernel = functools.partial(_attn_kernel, num_heads=H, head_dim=D)

    out = pl.pallas_call(
        kernel,
        out_shape=jax.ShapeDtypeStruct((B, N_pad, C), x.dtype),
        grid_spec=pltpu.PrefetchScalarGridSpec(
            num_scalar_prefetch=0,
            grid=(B, N_pad // TN),
            in_specs=[
                pl.BlockSpec((1, TN, C), lambda b, t: (b, t, 0)),   # x (query tile)
                pl.BlockSpec((1, M, C), lambda b, t: (b, 0, 0)),    # fl (full kv side)
                pl.BlockSpec((C, C), lambda b, t: (0, 0)),          # wq (pre-scaled)
                pl.BlockSpec((C, C), lambda b, t: (0, 0)),          # wk
                pl.BlockSpec((C, C), lambda b, t: (0, 0)),          # wv
                pl.BlockSpec((C, C), lambda b, t: (0, 0)),          # wp
                pl.BlockSpec((1, C), lambda b, t: (0, 0)),          # bias
            ],
            out_specs=pl.BlockSpec((1, TN, C), lambda b, t: (b, t, 0)),
            scratch_shapes=[
                pltpu.VMEM((H, M, D), x.dtype),   # kh: per-batch key heads
                pltpu.VMEM((H, M, D), x.dtype),   # vh: per-batch value heads
            ],
        ),
        compiler_params=pltpu.CompilerParams(
            # batch axis sharded across TensorCores; query-tile axis must be sequential
            # so the kh/vh scratch carry (computed at t==0) stays valid.
            dimension_semantics=("parallel", "arbitrary"),
            vmem_limit_bytes=vmem_limit,
        ),
    )(x_in, fl, wq, wk, wv, wp, bp)

    return out if N_pad == N else out[:, :N, :]


def pvt_attention_reference(x, fl, params, *, num_heads):
    """Plain-JAX reference matching the PyTorch Attention forward (dropout = identity)."""
    B, N, C = x.shape
    _, M, _ = fl.shape
    D = C // num_heads
    scale = D ** (-0.5)

    q = x @ params["wq"]                                     # (B, N, C)
    k = fl @ params["wk"]                                    # (B, M, C)
    v = fl @ params["wv"]                                    # (B, M, C)

    q = q.reshape(B, N, num_heads, D).transpose(0, 2, 1, 3)  # (B, H, N, D)
    k = k.reshape(B, M, num_heads, D).transpose(0, 2, 1, 3)  # (B, H, M, D)
    v = v.reshape(B, M, num_heads, D).transpose(0, 2, 1, 3)  # (B, H, M, D)

    attn = jnp.einsum("bhnd,bhmd->bhnm", q, k) * scale
    attn = jax.nn.softmax(attn, axis=-1)
    out = jnp.einsum("bhnm,bhmd->bhnd", attn, v)
    out = out.transpose(0, 2, 1, 3).reshape(B, N, C)
    return out @ params["wp"] + params["bp"]


if __name__ == "__main__":
    # Small shapes consistent with the module's forward (C divisible by num_heads).
    B, N, M, C = 2, 16, 16, 32
    num_heads = 4

    key = jax.random.PRNGKey(0)
    kx, kf, k1, k2, k3, k4, k5 = jax.random.split(key, 7)

    x = jax.random.normal(kx, (B, N, C), dtype=jnp.float32)
    fl = jax.random.normal(kf, (B, M, C), dtype=jnp.float32)

    # Deterministic parameter init (qkv_bias=False by default, proj has bias).
    init_scale = 0.02
    params = {
        "wq": init_scale * jax.random.normal(k1, (C, C), dtype=jnp.float32),
        "wk": init_scale * jax.random.normal(k2, (C, C), dtype=jnp.float32),
        "wv": init_scale * jax.random.normal(k3, (C, C), dtype=jnp.float32),
        "wp": init_scale * jax.random.normal(k4, (C, C), dtype=jnp.float32),
        "bp": init_scale * jax.random.normal(k5, (C,), dtype=jnp.float32),
    }

    # q_tile=8 exercises the query-tiled grid path (grid = (B, N // 8)) and, in
    # particular, the kh/vh scratch reuse across query tiles within a batch.
    out_tiled = pvt_attention(x, fl, params, num_heads=num_heads, q_tile=8)
    # Default path exercises the auto tile/pad/VMEM-budget selection (single tile here).
    out_auto = pvt_attention(x, fl, params, num_heads=num_heads)
    out_tiled, out_auto = jax.block_until_ready((out_tiled, out_auto))

    ref = pvt_attention_reference(x, fl, params, num_heads=num_heads)
    assert out_tiled.shape == (B, N, C)
    assert out_auto.shape == (B, N, C)
    # Tolerance accounts for approx reciprocal (EUP) and scale folded into wq.
    assert jnp.allclose(out_tiled, ref, atol=1e-3, rtol=1e-3), "tiled mismatch vs reference"
    assert jnp.allclose(out_auto, ref, atol=1e-3, rtol=1e-3), "auto mismatch vs reference"

    print("KERNEL_OK")
</pallas_src>

<mosaic_0001>
module attributes {stable_mosaic.version = 11 : i64} {
  func.func @_attn_kernel(%arg0: i32, %arg1: i32, %arg2: memref<1x8x32xf32, #tpu.memory_space<vmem>>, %arg3: memref<1x16x32xf32, #tpu.memory_space<vmem>>, %arg4: memref<32x32xf32, #tpu.memory_space<vmem>>, %arg5: memref<32x32xf32, #tpu.memory_space<vmem>>, %arg6: memref<32x32xf32, #tpu.memory_space<vmem>>, %arg7: memref<32x32xf32, #tpu.memory_space<vmem>>, %arg8: memref<1x32xf32, #tpu.memory_space<vmem>>, %arg9: memref<1x8x32xf32, #tpu.memory_space<vmem>>, %arg10: memref<4x16x8xf32, #tpu.memory_space<vmem>>, %arg11: memref<4x16x8xf32, #tpu.memory_space<vmem>>) attributes {dimension_semantics = [#tpu.dimension_semantics<parallel>, #tpu.dimension_semantics<arbitrary>], iteration_bounds = array<i64: 2, 2>, scalar_prefetch = 0 : i64, scratch_operands = 2 : i64, tpu.core_type = #tpu.core_type<tc>, window_params = [{transform_indices = @transform_0, window_bounds = array<i64: 1, 8, 32>}, {transform_indices = @transform_1, window_bounds = array<i64: 1, 16, 32>}, {pipeline_mode = #tpu.pipeline_mode<synchronous>, transform_indices = @transform_2, window_bounds = array<i64: 32, 32>}, {pipeline_mode = #tpu.pipeline_mode<synchronous>, transform_indices = @transform_3, window_bounds = array<i64: 32, 32>}, {pipeline_mode = #tpu.pipeline_mode<synchronous>, transform_indices = @transform_4, window_bounds = array<i64: 32, 32>}, {pipeline_mode = #tpu.pipeline_mode<synchronous>, transform_indices = @transform_5, window_bounds = array<i64: 32, 32>}, {pipeline_mode = #tpu.pipeline_mode<synchronous>, transform_indices = @transform_6, window_bounds = array<i64: 1, 32>}, {transform_indices = @transform_7, window_bounds = array<i64: 1, 8, 32>}]} {
    %c0_i32 = arith.constant 0 : i32
    %0 = arith.cmpi eq, %arg1, %c0_i32 : i32
    %1 = arith.extui %0 : i1 to i32
    %c0_i32_0 = arith.constant 0 : i32
    %2 = arith.cmpi ne, %1, %c0_i32_0 : i32
    scf.if %2 {
      %c0_23 = arith.constant 0 : index
      %c0_24 = arith.constant 0 : index
      %c0_25 = arith.constant 0 : index
      %33 = vector.load %arg3[%c0_23, %c0_24, %c0_25] : memref<1x16x32xf32, #tpu.memory_space<vmem>>, vector<1x16x32xf32>
      %34 = vector.shape_cast %33 : vector<1x16x32xf32> to vector<16x32xf32>
      %c0_26 = arith.constant 0 : index
      %c0_27 = arith.constant 0 : index
      %35 = vector.load %arg5[%c0_26, %c0_27] : memref<32x32xf32, #tpu.memory_space<vmem>>, vector<32x32xf32>
      %cst_28 = arith.constant dense<0.000000e+00> : vector<16x32xf32>
      %36 = tpu.matmul %34, %35, %cst_28 {dimension_numbers = #tpu.dot_dimension_numbers<[1], [0], [0], [1], [0, 0, 1, 1], [], []>} : vector<16x32xf32>, vector<32x32xf32>, vector<16x32xf32> -> vector<16x32xf32>
      %c0_29 = arith.constant 0 : index
      %c0_30 = arith.constant 0 : index
      %37 = vector.load %arg6[%c0_29, %c0_30] : memref<32x32xf32, #tpu.memory_space<vmem>>, vector<32x32xf32>
      %cst_31 = arith.constant dense<0.000000e+00> : vector<16x32xf32>
      %38 = tpu.matmul %34, %37, %cst_31 {dimension_numbers = #tpu.dot_dimension_numbers<[1], [0], [0], [1], [0, 0, 1, 1], [], []>} : vector<16x32xf32>, vector<32x32xf32>, vector<16x32xf32> -> vector<16x32xf32>
      %39 = vector.shape_cast %36 : vector<16x32xf32> to vector<16x4x8xf32>
      %40 = tpu.transpose %39, [1, 0, 2] : vector<16x4x8xf32> -> vector<4x16x8xf32>
      %c0_32 = arith.constant 0 : index
      %c0_33 = arith.constant 0 : index
      %c0_34 = arith.constant 0 : index
      %41 = vector.load %arg10[%c0_32, %c0_33, %c0_34] : memref<4x16x8xf32, #tpu.memory_space<vmem>>, vector<4x16x8xf32>
      tpu.vector_store %arg10[%c0_32, %c0_33, %c0_34], %40 {strides = array<i32>} : memref<4x16x8xf32, #tpu.memory_space<vmem>>, vector<4x16x8xf32>,
      %42 = vector.shape_cast %38 : vector<16x32xf32> to vector<16x4x8xf32>
      %43 = tpu.transpose %42, [1, 0, 2] : vector<16x4x8xf32> -> vector<4x16x8xf32>
      %c0_35 = arith.constant 0 : index
      %c0_36 = arith.constant 0 : index
      %c0_37 = arith.constant 0 : index
      %44 = vector.load %arg11[%c0_35, %c0_36, %c0_37] : memref<4x16x8xf32, #tpu.memory_space<vmem>>, vector<4x16x8xf32>
      tpu.vector_store %arg11[%c0_35, %c0_36, %c0_37], %43 {strides = array<i32>} : memref<4x16x8xf32, #tpu.memory_space<vmem>>, vector<4x16x8xf32>,
    } else {
    }
    %c0 = arith.constant 0 : index
    %c0_1 = arith.constant 0 : index
    %c0_2 = arith.constant 0 : index
    %3 = vector.load %arg2[%c0, %c0_1, %c0_2] : memref<1x8x32xf32, #tpu.memory_space<vmem>>, vector<1x8x32xf32>
    %4 = vector.shape_cast %3 : vector<1x8x32xf32> to vector<8x32xf32>
    %c0_3 = arith.constant 0 : index
    %c0_4 = arith.constant 0 : index
    %5 = vector.load %arg4[%c0_3, %c0_4] : memref<32x32xf32, #tpu.memory_space<vmem>>, vector<32x32xf32>
    %cst = arith.constant dense<0.000000e+00> : vector<8x32xf32>
    %6 = tpu.matmul %4, %5, %cst {dimension_numbers = #tpu.dot_dimension_numbers<[1], [0], [0], [1], [0, 0, 1, 1], [], []>} : vector<8x32xf32>, vector<32x32xf32>, vector<8x32xf32> -> vector<8x32xf32>
    %7 = vector.shape_cast %6 : vector<8x32xf32> to vector<8x4x8xf32>
    %8 = tpu.transpose %7, [1, 0, 2] : vector<8x4x8xf32> -> vector<4x8x8xf32>
    %c0_5 = arith.constant 0 : index
    %c0_6 = arith.constant 0 : index
    %c0_7 = arith.constant 0 : index
    %9 = vector.load %arg10[%c0_5, %c0_6, %c0_7] : memref<4x16x8xf32, #tpu.memory_space<vmem>>, vector<4x16x8xf32>
    %cst_8 = arith.constant dense<0.000000e+00> : vector<4x8x16xf32>
    %10 = tpu.matmul %8, %9, %cst_8 {dimension_numbers = #tpu.dot_dimension_numbers<[2], [2], [1], [1], [0, 0, 0, 1, 1, 1], [0], [0]>} : vector<4x8x8xf32>, vector<4x16x8xf32>, vector<4x8x16xf32> -> vector<4x8x16xf32>
    %cst_9 = arith.constant dense<0xFF800000> : vector<4x8xf32>
    %11 = vector.multi_reduction <maximumf>, %10, %cst_9 [2] : vector<4x8x16xf32> to vector<4x8xf32>
    %12 = vector.shape_cast %11 : vector<4x8xf32> to vector<4x8x1xf32>
    %13 = vector.broadcast %12 : vector<4x8x1xf32> to vector<4x8x16xf32>
    %14 = arith.subf %10, %13 : vector<4x8x16xf32>
    %15 = math.exp %14 : vector<4x8x16xf32>
    %cst_10 = arith.constant dense<0.000000e+00> : vector<4x8xf32>
    %16 = vector.multi_reduction <add>, %15, %cst_10 [2] : vector<4x8x16xf32> to vector<4x8xf32>
    %17 = vector.shape_cast %16 : vector<4x8xf32> to vector<4x8x1xf32>
    %18 = tpu.reciprocal %17 {approx = true} : vector<4x8x1xf32> -> vector<4x8x1xf32>
    %19 = vector.broadcast %18 : vector<4x8x1xf32> to vector<4x8x16xf32>
    %20 = arith.mulf %15, %19 : vector<4x8x16xf32>
    %c0_11 = arith.constant 0 : index
    %c0_12 = arith.constant 0 : index
    %c0_13 = arith.constant 0 : index
    %21 = vector.load %arg11[%c0_11, %c0_12, %c0_13] : memref<4x16x8xf32, #tpu.memory_space<vmem>>, vector<4x16x8xf32>
    %cst_14 = arith.constant dense<0.000000e+00> : vector<4x8x8xf32>
    %22 = tpu.matmul %20, %21, %cst_14 {dimension_numbers = #tpu.dot_dimension_numbers<[2], [1], [1], [2], [0, 0, 0, 1, 1, 2], [0], [0]>} : vector<4x8x16xf32>, vector<4x16x8xf32>, vector<4x8x8xf32> -> vector<4x8x8xf32>
    %23 = tpu.transpose %22, [1, 0, 2] : vector<4x8x8xf32> -> vector<8x4x8xf32>
    %24 = vector.shape_cast %23 : vector<8x4x8xf32> to vector<8x32xf32>
    %c0_15 = arith.constant 0 : index
    %c0_16 = arith.constant 0 : index
    %25 = vector.load %arg7[%c0_15, %c0_16] : memref<32x32xf32, #tpu.memory_space<vmem>>, vector<32x32xf32>
    %cst_17 = arith.constant dense<0.000000e+00> : vector<8x32xf32>
    %26 = tpu.matmul %24, %25, %cst_17 {dimension_numbers = #tpu.dot_dimension_numbers<[1], [0], [0], [1], [0, 0, 1, 1], [], []>} : vector<8x32xf32>, vector<32x32xf32>, vector<8x32xf32> -> vector<8x32xf32>
    %c0_18 = arith.constant 0 : index
    %c0_19 = arith.constant 0 : index
    %27 = vector.load %arg8[%c0_18, %c0_19] : memref<1x32xf32, #tpu.memory_space<vmem>>, vector<1x32xf32>
    %28 = vector.broadcast %27 : vector<1x32xf32> to vector<8x32xf32>
    %29 = arith.addf %26, %28 : vector<8x32xf32>
    %c0_20 = arith.constant 0 : index
    %c0_21 = arith.constant 0 : index
    %c0_22 = arith.constant 0 : index
    %30 = vector.load %arg9[%c0_20, %c0_21, %c0_22] : memref<1x8x32xf32, #tpu.memory_space<vmem>>, vector<1x8x32xf32>
    %31 = vector.shape_cast %30 : vector<1x8x32xf32> to vector<8x32xf32>
    %32 = vector.shape_cast %29 : vector<8x32xf32> to vector<1x8x32xf32>
    tpu.vector_store %arg9[%c0_20, %c0_21, %c0_22], %32 {strides = array<i32>} : memref<1x8x32xf32, #tpu.memory_space<vmem>>, vector<1x8x32xf32>,
    return
  }
  func.func @transform_0(%arg0: i32, %arg1: i32) -> (i32, i32, i32) {
    %c0_i32 = arith.constant 0 : i32
    %c0_i32_0 = arith.constant 0 : i32
    return %arg0, %arg1, %c0_i32 : i32, i32, i32
  }
  func.func @transform_1(%arg0: i32, %arg1: i32) -> (i32, i32, i32) {
    %c0_i32 = arith.constant 0 : i32
    %c0_i32_0 = arith.constant 0 : i32
    %c0_i32_1 = arith.constant 0 : i32
    return %arg0, %c0_i32, %c0_i32_0 : i32, i32, i32
  }
  func.func @transform_2(%arg0: i32, %arg1: i32) -> (i32, i32) {
    %c0_i32 = arith.constant 0 : i32
    %c0_i32_0 = arith.constant 0 : i32
    %c0_i32_1 = arith.constant 0 : i32
    return %c0_i32, %c0_i32_0 : i32, i32
  }
  func.func @transform_3(%arg0: i32, %arg1: i32) -> (i32, i32) {
    %c0_i32 = arith.constant 0 : i32
    %c0_i32_0 = arith.constant 0 : i32
    %c0_i32_1 = arith.constant 0 : i32
    return %c0_i32, %c0_i32_0 : i32, i32
  }
  func.func @transform_4(%arg0: i32, %arg1: i32) -> (i32, i32) {
    %c0_i32 = arith.constant 0 : i32
    %c0_i32_0 = arith.constant 0 : i32
    %c0_i32_1 = arith.constant 0 : i32
    return %c0_i32, %c0_i32_0 : i32, i32
  }
  func.func @transform_5(%arg0: i32, %arg1: i32) -> (i32, i32) {
    %c0_i32 = arith.constant 0 : i32
    %c0_i32_0 = arith.constant 0 : i32
    %c0_i32_1 = arith.constant 0 : i32
    return %c0_i32, %c0_i32_0 : i32, i32
  }
  func.func @transform_6(%arg0: i32, %arg1: i32) -> (i32, i32) {
    %c0_i32 = arith.constant 0 : i32
    %c0_i32_0 = arith.constant 0 : i32
    %c0_i32_1 = arith.constant 0 : i32
    return %c0_i32, %c0_i32_0 : i32, i32
  }
  func.func @transform_7(%arg0: i32, %arg1: i32) -> (i32, i32, i32) {
    %c0_i32 = arith.constant 0 : i32
    %c0_i32_0 = arith.constant 0 : i32
    return %arg0, %arg1, %c0_i32 : i32, i32, i32
  }
}

</mosaic_0001>

<bundles_post_ra>
// kernel: tpu_custom_call.1
= control target key start
LH: loop header
LB: loop body
LE: loop exit
PB: predicated region body
PF: predicated region fallthrough
CT: control target
= control target key end

     0   :  { %s3001_s0 = inlined_call_operand.hbm [shape: f32[2,16,32], index: 0, kind: input, shape index: {}]   ;;  %s3002_s1 = inlined_call_operand.hbm [shape: f32[2,16,32], index: 1, kind: input, shape index: {}]   ;;  %s3003_s2 = inlined_call_operand.hbm [shape: f32[32,32], index: 2, kind: input, shape index: {}]   ;;  %s3004_s3 = inlined_call_operand.hbm [shape: f32[32,32], index: 3, kind: input, shape index: {}]   ;;  %s3005_s4 = inlined_call_operand.hbm [shape: f32[32,32], index: 4, kind: input, shape index: {}]   ;;  %s3006_s5 = inlined_call_operand.hbm [shape: f32[32,32], index: 5, kind: input, shape index: {}]   ;;  %s3007_s6 = inlined_call_operand.vmem [shape: f32[1,32], index: 6, kind: input, shape index: {}]   ;;  %s3008_s7 = inlined_call_operand.hbm [shape: f32[2,16,32], index: 7, kind: output, shape index: {}]  }
   0x1   :  { %3020 = sst [smem:[#allocation30_spill]] %s3001_s0 }
   0x2   :  { %3021 = sst [smem:[#allocation31_spill]] %s3003_s2 }
   0x3   :  { %3022 = sst [smem:[#allocation32_spill]] %s3004_s3 }
   0x4   :  { %3023 = sst [smem:[#allocation33_spill]] %s3005_s4 }
   0x5   :  { %3024 = sst [smem:[#allocation34_spill]] %s3006_s5 }
   0x6   :  { %3025 = sst [smem:[#allocation35_spill]] %s3007_s6 }
   0x7   :  { %3026 = sst [smem:[#allocation36_spill]] %s3008_s7 }
   0x8   :  { %12 = vsyncpa [#allocation5], 0 }
   0x9   :  { %14 = vsyncpa [#allocation5 + $0x1], 0 }
   0xa   :  { %15 = vsyncpa [#allocation8], 0 }
   0xb   :  { %17 = vsyncpa [#allocation8 + $0x1], 0 }
   0xc   :  { %18 = vsyncpa [#allocation11], 0 }
   0xd   :  { %19 = vsyncpa [#allocation14], 0 }
   0xe   :  { %20 = vsyncpa [#allocation6], 0 }
   0xf   :  { %22 = vsyncpa [#allocation6 + $0x1], 0  ;;  %s2347_s24 = smov 0   ;;  %s2349_s25 = smov 0  }
  0x10   :  { %s2351_s26 = smov 0   ;;  %s2353_s27 = smov 0  }
  0x11   :  { %s2355_s28 = smov 0   ;;  %s2357_s29 = smov 0  }
  0x12   :  { %s2359_s30 = smov 0   ;;  %s2361_s8 = smov 0  }
  0x13   :  { %s2363_s9 = smov 0   ;;  %s2365_s10 = smov 0  }
  0x14   :  { %s2367_s11 = smov 0  }
  0x15 LB: > { %3027 = sst [smem:[#allocation22_spill]] %s2258_s27  ;;  %s2403_s12 = sadd.s32 4294967295, %s2286_s11   ;;  %s2286_s11 = sphi %s2367_s11, %s28_s11   ;;  %s2282_s10 = sphi %s2365_s10, %s3069_s10   ;;  %s2278_s9 = sphi %s2363_s9, %s3061_s9   ;;  %s2274_s8 = sphi %s2361_s8, %s3068_s8   ;;  %s2270_s30 = sphi %s2359_s30, %s3060_s30   ;;  %s2266_s29 = sphi %s2357_s29, %s3059_s29   ;;  %s2262_s28 = sphi %s2355_s28, %s3067_s28   ;;  %s2258_s27 = sphi %s2353_s27, %s3066_s27   ;;  %s2254_s26 = sphi %s2351_s26, %s3065_s26   ;;  %s2250_s25 = sphi %s2349_s25, %s3064_s25   ;;  %s2246_s24 = sphi %s2347_s24, %s3063_s24  }
  0x16   : > { %3028 = sst [smem:[#allocation23_spill]] %s2266_s29  ;;  %p1731_p0 = scmp.ge.s32.totalorder %s2286_s11, 1 }
  0x17   : > { %3029 = sst [smem:[#allocation24_spill]] %s2278_s9  ;;  %p63_p1 = scmp.eq.s32.totalorder %s2403_s12, 0 }
  0x18   : > { %p232_p2 = scmp.lt.s32.totalorder %s2286_s11, 5  ;;  %s3030_s2 = sld [smem:[#allocation31_spill]] }
  0x19   : > { %s2288_s17 = smov [#allocation9]   ;;  %s3033_s3 = sld [smem:[#allocation32_spill]] }
  0x1a   : > { %p2411_p3 = pnand %p1731_p0, %p232_p2  ;;  %s245_s18 = sshll.u32 %s2288_s17, 4  ;;  %s246_s18 = int_to_ptr.vmem [resolvable:$true] %s245_s18 }
  0x1b   : > { %s3009_s23 = smov 128   ;;  %s3010_s13 = smov 8  }
  0x1c   : > { %p1810_p4 = pneg %p2411_p3  ;;  %s2291_s14 = smov [#allocation10]  }
  0x1d   : > { %s259_s17 = sshll.u32 %s2291_s14, 4  ;;  %s3034_s4 = sld [smem:[#allocation33_spill]]  ;;  %s260_s17 = int_to_ptr.vmem [resolvable:$true] %s259_s17 }
  0x1e   : > { %s243_s15 = sshll.u32 %s3030_s2, 4  ;;  %p2419_p5 = pnand %p1810_p4, %p63_p1  ;;  %s244_s15 = int_to_ptr.hbm [resolvable:$true] %s243_s15 }
  0x1f   : > { %s257_s22 = sshll.u32 %s3033_s3, 4  ;;  %s3035_s5 = sld [smem:[#allocation34_spill]]  ;;  %s258_s22 = int_to_ptr.hbm [resolvable:$true] %s257_s22 }
  0x20   : > { %1813 = dma.hbm_to_vmem [thread:$0]  (!%p2419_p5), %s244_s15, 512, %s246_s18, [#allocation8], %s3009_s23, %s3009_s23, %s3010_s13  }
  0x21   : > { %1816 = dma.hbm_to_vmem [thread:$0]  (!%p2419_p5), %s258_s22, 512, %s260_s17, [#allocation11], %s3009_s23, %s3009_s23, %s3010_s13  }
  0x22   : > { %s2292_s14 = smov [#allocation12]   ;;  %s2293_s6 = smov [#allocation13]  }
  0x23   : > { %s271_s20 = sshll.u32 %s3034_s4, 4  ;;  %s273_s2 = sshll.u32 %s2292_s14, 4  ;;  %s272_s20 = int_to_ptr.hbm [resolvable:$true] %s271_s20  ;;  %s274_s2 = int_to_ptr.vmem [resolvable:$true] %s273_s2 }
  0x24   : > { %1819 = dma.hbm_to_vmem [thread:$0]  (!%p2419_p5), %s272_s20, 512, %s274_s2, [#allocation11], %s3009_s23, %s3009_s23, %s3010_s13  }
  0x25   : > { %s285_s18 = sshll.u32 %s3035_s5, 4  ;;  %s287_s22 = sshll.u32 %s2293_s6, 4  ;;  %s286_s18 = int_to_ptr.hbm [resolvable:$true] %s285_s18  ;;  %s288_s22 = int_to_ptr.vmem [resolvable:$true] %s287_s22 }
  0x26   : > { %1822 = dma.hbm_to_vmem [thread:$0]  (!%p2419_p5), %s286_s18, 512, %s288_s22, [#allocation14], %s3009_s23, %s3009_s23, %s3010_s13  }
  0x27   : > { %s1730_s17 = sadd.s32 4294967294, %s2286_s11   ;;  %s37_s20 = sadd.s32 1, %s2278_s9 }
  0x28   : > { %p38_p6 = scmp.ge.s32.totalorder %s37_s20, 2  ;;  %s40_s21 = sadd.s32 1, %s2282_s10 }
  0x29   : > { %s49_s15 = sadd.s32 1, %s2266_s29  ;;  %p3012_p7 = scmp.ne.s32.totalorder %s2266_s29, %s2262_s28 }
  0x2a   : > { %s3071_s20 = smov (%p38_p6, %s37_s20), 0  ;;  %s3073_s21 = smov (!%p38_p6, %s40_s21), %s2282_s10 }
  0x2b   : > { %3036 = sst [smem:[#allocation25_spill]] %s3071_s20  ;;  %s45_s19 = ssub.s32 %s2278_s9, %s3071_s20 }
  0x2c   : > { %p57_p8 = scmp.eq.s32.totalorder %s2286_s11, 0  ;;  %p42_p9 = scmp.ge.s32.totalorder %s3073_s21, 2 }
  0x2d   : > { %p3011_p10 = scmp.ne.s32.totalorder %s2262_s28, %s2258_s27  ;;  %s75_s14 = sadd.s32 1, %s2254_s26 }
  0x2e   : > { %p2471_p11 = por %p57_p8, %p3012_p7  ;;  %s3075_s21 = smov (%p42_p9, %s3073_s21), 0 }
  0x2f   : > { %3038 = sst [smem:[#allocation26_spill]] %s3075_s21  ;;  %p2483_p12 = por %p63_p1, %p3011_p10 }
  0x30   : > { %p82_p13 = scmp.ne.s32.totalorder %s2254_s26, %s2250_s25  ;;  %s44_s6 = ssub.s32 %s2282_s10, %s3075_s21 }
  0x31   : > { %p88_p0 = scmp.ne.s32.totalorder %s2250_s25, %s2246_s24  ;;  %s46_s22 = sor.u32 %s45_s19, %s44_s6 }
  0x32   : > { %p73_p2 = scmp.eq.s32.totalorder %s44_s6, 0  ;;  %p47_p4 = scmp.eq.s32.totalorder %s46_s22, 0 }
  0x33   : > { %p2495_p5 = por %p82_p13, %p57_p8  ;;  %p2507_p6 = por %p88_p0, %p63_p1 }
  0x34   : > { %s2500_s13 = scalar_select %p73_p2, %s2254_s26, %s75_s14  }
  0x35   : > { %s2503_s3 = scalar_select %p47_p4, %s2266_s29, %s49_s15  }
  0x36   : > { %3041 = sst [smem:[#allocation27_spill]] %s2500_s13  ;;  %p219_p9 = scmp.eq.s32.totalorder %s2403_s12, 3 }
  0x37   : > { %3042 = sst [smem:[#allocation28_spill]] %s2503_s3  ;;  %p225_p10 = scmp.eq.s32.totalorder %s1730_s17, 3 }
  0x38   : > { %p1838_p7 = scmp.lt.s32.totalorder %s2286_s11, 4  ;;  %p3044_p8 = scmp.ne.s32.totalorder %s2266_s29, %s2262_s28 }
  0x39   : > { %s304_s15 = sand.u32 1, %s2266_s29   ;;  %p3046_p2 = scmp.ne.s32.totalorder %s2262_s28, %s2258_s27 }
  0x3a   : > { %p2516_p13 = por %p219_p9, %p3044_p8  ;;  %s1737_s14 = sshll.u32 %s304_s15, 3 }
  0x3b   : > { %p2524_p4 = por %p225_p10, %p3046_p2  ;;  %s1738_s6 = sshll.u32 %s2282_s10, 1 }
  0x3c   : > { %s312_s17 = sadd.s32 %s2278_s9, %s1738_s6  ;;  %s308_s5 = scalar_lea.vmem [#allocation4], %s1737_s14 }
  0x3d   : > { %s3047_s19 = scalar_select %p2524_p4, 1, 0 }
  0x3e   : > { %s1739_s22 = sshll.u32 %s312_s17, 3  ;;  %s318_s21 = sshll.u32 %s308_s5, 4  ;;  %s319_s21 = int_to_ptr.vmem [resolvable:$true] %s318_s21 }
  0x3f   : > { %3048 = sst [smem:[#allocation29_spill]] %s3047_s19  ;;  %p1824_p10 = pnand %p1838_p7, %p2471_p11 }
  0x40   : > { %s3049_s0 = sld [smem:[#allocation30_spill]]  ;;  %p2541_p0 = pnand %p1838_p7, %p2495_p5 }
  0x41   : > { %s325_s6 = sand.u32 1, %s2286_s11   ;;  %s305_s14 = scalar_lea.sflag [#allocation5], %s304_s15 }
  0x42   : > { %s327_s5 = sand.u32 1, %s2254_s26   ;;  %s1779_s17 = sshll.u32 %s2282_s10, 4 }
  0x43   : > { %s1740_s3 = sshll.u32 %s327_s5, 4  ;;  %s326_s9 = scalar_lea.sflag [#allocation8], %s325_s6 }
  0x44   : > { %s3051_s19 = smov 8   ;;  %s3052_s27 = smov 128  }
  0x46   : > { %s314_s13 = scalar_lea.hbm %s3049_s0, %s1739_s22  ;;  %s329_s0 = scalar_lea.vmem [#allocation7], %s1740_s3 }
  0x47   : > { %s316_s7 = sshll.u32 %s314_s13, 4  ;;  %s334_s13 = scalar_lea.hbm %s3002_s1, %s1779_s17  ;;  %s317_s7 = int_to_ptr.hbm [resolvable:$true] %s316_s7 }
  0x48   : > { %1826 = dma.hbm_to_vmem [thread:$0]  (!%p1824_p10), %s317_s7, 128, %s319_s21, %s305_s14  }
  0x49   : > { %s335_s18 = sshll.u32 %s334_s13, 4  ;;  %s337_s23 = sshll.u32 %s329_s0, 4  ;;  %s336_s18 = int_to_ptr.hbm [resolvable:$true] %s335_s18  ;;  %s338_s23 = int_to_ptr.vmem [resolvable:$true] %s337_s23 }
  0x4a   : > { %1829 = dma.hbm_to_vmem [thread:$0]  (!%p2541_p0), %s336_s18, 256, %s338_s23, %s326_s9, %s3052_s27, %s3052_s27, %s3051_s19  }
  0x4b   : > { %349 = sbr.rel (%p2411_p3) target bundleno = 1518 (0x5ee), region = 48  ;;  %s2559_s7 = sand.u32 (!%p2411_p3), 1, %s2262_s28  }
  0x4c   : > { %s1744_s21 = sshll.u32 (!%p2411_p3), %s2559_s7, 3  ;;  %s352_s15 = scalar_lea.sflag (!%p2411_p3), [#allocation5], %s2559_s7 }
  0x4d   : > { %s2563_s14 = scalar_lea.vmem (!%p2411_p3), [#allocation4], %s1744_s21 }
  0x50   : > { %2221 = dma.done.wait (%p2483_p12), %s352_s15, 128  }
  0x51   : > { %2223 = vsyncadd (%p2483_p12), %s352_s15, 4294967168  ;;  %s361_s0 = sand.u32 1, %s2403_s12   ;;  %s363_s27 = sand.u32 1, %s2250_s25  }
  0x52   : > { %s2571_s29 = sshll.u32 %s363_s27, 4  ;;  %s362_s9 = scalar_lea.sflag [#allocation8], %s361_s0 }
  0x53   : > { %s365_s16 = scalar_lea.vmem [#allocation7], %s2571_s29 }
  0x54   : > { %2225 = dma.done.wait (%p2507_p6), %s362_s9, 256  }
  0x55   : > { %2227 = vsyncadd (%p2507_p6), %s362_s9, 4294967040 }
  0x56   : > { %2229 = dma.done.wait (%p63_p1), [#allocation8], 512  }
  0x57   : > { %2231 = vsyncadd (%p63_p1), [#allocation8], 4294966784 }
  0x58   : > { %2233 = dma.done.wait (%p63_p1), [#allocation11], 1024  }
  0x59   : > { %2235 = vsyncadd (%p63_p1), [#allocation11], 4294966272 }
  0x5a   : > { %2237 = dma.done.wait (%p63_p1), [#allocation14], 512  }
  0x5b   : > { %2239 = vsyncadd (%p63_p1), [#allocation14], 4294966784  ;;  %s2590_s4 = scalar_lea.vmem [#allocation15], %s1744_s21  ;;  %p1751_p3 = scmp.ne.s32.totalorder %s2270_s30, 0 }
  0x5c   : > { %s2294_s12 = smov (!%p1751_p3), 112   ;;  %s2295_s2 = smov (!%p1751_p3), 120  }
  0x5d   : > { %425 = sbr.rel (%p1751_p3) target bundleno = 422 (0x1a6), region = 76  ;;  %s2296_s19 = smov (!%p1751_p3), 104  }
  0x62   : > { %v431_v0 = vld [vmem:[#allocation10 + $0x18] sm:$0xff]  ;;  %v430_v2 = vld [vmem:[#allocation10 + $0x10] sm:$0xff]  ;;  %v429_v4 = vld [vmem:[#allocation10 + $0x8] sm:$0xff]  ;;  %vm432_vm0 = vcmask 261120   ;;  %v2297_v16 = vmov 1983009808  }
  0x63   : > { %v465_v1 = vld [vmem:[#allocation12 + $0x18] sm:$0xff]  ;;  %451 = vmatpush.msra.mxu0 %v431_v0  ;;  %v464_v3 = vld [vmem:[#allocation12 + $0x10] sm:$0xff]  ;;  %v463_v5 = vld [vmem:[#allocation12 + $0x8] sm:$0xff]  ;;  %1780 = vmatpush.msra.mxu2 %v431_v0  ;;  %v515_v17 = vunpack.c.l.s4 %v2297_v16  ;;  %vm510_vm1 = vcmask 1047556   ;;  %v2298_v28 = vmov 1934713408  }
  0x64   : > { %478 = vmatpush.msra.mxu1 %v465_v1  ;;  %1784 = vmatpush.msra.mxu3 %v465_v1  ;;  %v428_v6 = vld [vmem:[#allocation10] sm:$0xff]  ;;  %v427_v9 = vld [vmem:[%s365_s16 + $0x8] sm:$0xff]  ;;  %v539_v29 = vunpack.c.l.s4 %v2298_v28  ;;  %vm730_vm2 = vcmask 64512  }
  0x65   : > { %452 = vmatpush.msra.mxu0 %v430_v2  ;;  %v462_v7 = vld [vmem:[#allocation12] sm:$0xff]  ;;  %1781 = vmatpush.msra.mxu2 %v430_v2  ;;  %v2606_v23 = vunpack.c.0.s8 %v515_v17 }
  0x66   : > { %479 = vmatpush.msra.mxu1 %v464_v3  ;;  %1785 = vmatpush.msra.mxu3 %v464_v3  ;;  %v426_v8 = vld [vmem:[%s365_s16] sm:$0xff]  ;;  %v2618_v41 = vunpack.c.0.s8 %v539_v29 }
  0x67   : > { %453 = vmatpush.msra.mxu0 %v429_v4  ;;  %1782 = vmatpush.msra.mxu2 %v429_v4 }
  0x68   : > { %480 = vmatpush.msra.mxu1 %v463_v5  ;;  %1786 = vmatpush.msra.mxu3 %v463_v5 }
  0x69   : > { %454 = vmatpush.msra.mxu0 %v428_v6  ;;  %1783 = vmatpush.msra.mxu2 %v428_v6 }
  0x6a   : > { %481 = vmatpush.msra.mxu1 %v462_v7  ;;  %1752 = vmatmul.msk.f32.vlgmr.msra.gmra.mxu0 %vm432_vm0, %v426_v8 }
  0x6b   : > { %1754 = vmatmul.msk.f32.vlgmr.msra.gmra.mxu1 %vm432_vm0, %v426_v8  ;;  %1787 = vmatpush.msra.mxu3 %v462_v7 }
  0x6c   : > { %1755 = vmatmul.msk.f32.vlgmr.msra.gmra.mxu3 %vm432_vm0, %v427_v9  ;;  %1753 = vmatmul.msk.f32.vlgmr.msra.gmra.mxu2 %vm432_vm0, %v427_v9 }
  0xe7   : > { %v456_v10 = vpop.f32.mrf.mxu0 }
  0xe8   : > { %v483_v11 = vpop.f32.mrf.mxu1  ;;  %491 = vrot.lane.b32.xlu2 %v456_v10, %s2295_s2  ;;  %497 = vrot.lane.b32.xlu0 %v456_v10, %s2294_s12  ;;  %v512_v21 = vrot.slane %v456_v10, 4 }
  0xe9   : > { %747 = vrot.lane.b32.xlu1 %v483_v11, %s2294_s12  ;;  %v761_v26 = vrot.slane %v483_v11, 4 }
  0xef   : > { %v486_v12 = vpop.f32.mrf.mxu3  ;;  %v2597_v13 = vpop.f32.mrf.mxu2 }
  0xf0   : > { %741 = vrot.lane.b32.xlu2 %v483_v11, %s2295_s2  ;;  %503 = vrot.lane.b32.xlu0 %v456_v10, %s2296_s19  ;;  %v817_v30 = vrot.slane %v486_v12, 4  ;;  %v568_v44 = vrot.slane %v2597_v13, 4 }
  0xf1   : > { %749 = vrot.lane.b32.xlu1 %v486_v12, %s2294_s12 }
  0xf8   : > { %493 = vrot.lane.b32.xlu2 %v2597_v13, %s2295_s2  ;;  %499 = vrot.lane.b32.xlu0 %v2597_v13, %s2294_s12 }
  0xf9   : > { %505 = vrot.lane.b32.xlu1 %v2597_v13, %s2296_s19 }
 0x100   : > { %755 = vrot.lane.b32.xlu2 %v486_v12, %s2296_s19  ;;  %743 = vrot.lane.b32.xlu0 %v486_v12, %s2295_s2 }
 0x101   : > { %753 = vrot.lane.b32.xlu1 %v483_v11, %s2296_s19 }
 0x142   : > { %v492_v14 = vpop.permute.xlu2 %491 }
 0x143   : > { %v524_v33 = vrot.slane %v492_v14, 4 }
 0x14a   : > { %v2602_v15 = vpop.permute.xlu2 %741 }
 0x14b   : > { %v773_v49 = vrot.slane %v2602_v15, 4 }
 0x152   : > { %v2604_v19 = vpop.permute.xlu2 %493 }
 0x153   : > { %v580_v57 = vrot.slane %v2604_v19, 4 }
 0x15a   : > { %v498_v20 = vpop.permute.xlu0 %497  ;;  %v2625_v46 = vpop.permute.xlu2 %755 }
 0x15b   : > { %v748_v18 = vpop.permute.xlu1 %747  ;;  %v509_v22 = vrot.slane %v498_v20, 4  ;;  %v513_v25 = vsel %vm510_vm1, %v498_v20, %v512_v21  ;;  %v827_v59 = vrot.slane %v2625_v46, 4 }
 0x15c   : > { %v759_v24 = vrot.slane %v748_v18, 4  ;;  %v762_v31 = vsel %vm510_vm1, %v748_v18, %v761_v26  ;;  %v521_v32 = vperm.slane %v513_v25, %v2606_v23 }
 0x15d   : > { %v511_v27 = vsel %vm510_vm1, %v509_v22, %v456_v10  ;;  %v2616_v40 = vperm.slane %v762_v31, %v2606_v23 }
 0x15e   : > { %v760_v34 = vsel %vm510_vm1, %v759_v24, %v483_v11  ;;  %v517_v35 = vperm.slane %v511_v27, %v2606_v23  ;;  %v548_v47 = vrot.slane %v521_v32, 4 }
 0x15f   : > { %v2623_v45 = vperm.slane %v760_v34, %v2606_v23  ;;  %v797_v58 = vrot.slane %v2616_v40, 4 }
 0x160   : > { %v536_v50 = vrot.slane %v517_v35, 4 }
 0x161   : > { %v785_v61 = vrot.slane %v2623_v45, 4 }
 0x162   : > { %v504_v39 = vpop.permute.xlu0 %503 }
 0x163   : > { %v750_v36 = vpop.permute.xlu1 %749  ;;  %v522_v42 = vrot.slane %v504_v39, 4  ;;  %v525_v43 = vsel %vm510_vm1, %v504_v39, %v524_v33 }
 0x164   : > { %v815_v37 = vrot.slane %v750_v36, 4  ;;  %v818_v38 = vsel %vm510_vm1, %v750_v36, %v817_v30  ;;  %v533_v48 = vperm.slane %v525_v43, %v2606_v23 }
 0x165   : > { %v2630_v51 = vperm.slane %v818_v38, %v2606_v23  ;;  %v523_v52 = vsel %vm510_vm1, %v522_v42, %v492_v14 }
 0x166   : > { %v816_v53 = vsel %vm510_vm1, %v815_v37, %v486_v12  ;;  %v529_v54 = vperm.slane %v523_v52, %v2606_v23  ;;  %v546_v55 = vrot.slane %v533_v48, 4  ;;  %v549_v56 = vsel %vm510_vm1, %v533_v48, %v548_v47 }
 0x167   : > { %v557_v60 = vperm.slane %v549_v56, %v2618_v41  ;;  %v2644_v1 = vperm.slane %v816_v53, %v2606_v23  ;;  %v853_v6 = vrot.slane %v2630_v51, 4 }
 0x168   : > { %v534_v62 = vrot.slane %v529_v54, 4  ;;  %v537_v63 = vsel %vm510_vm1, %v529_v54, %v536_v50  ;;  %v547_v0 = vsel %vm510_vm1, %v546_v55, %v521_v32 }
 0x169   : > { %v545_v2 = vperm.slane %v537_v63, %v2618_v41  ;;  %v553_v3 = vperm.slane %v547_v0, %v2618_v41  ;;  %v564_v4 = vrot.slane %v557_v60, 4 }
 0x16a   : > { %v535_v7 = vsel %vm510_vm1, %v534_v62, %v517_v35  ;;  %v500_v26 = vpop.permute.xlu0 %499 }
 0x16b   : > { %v506_v5 = vpop.permute.xlu1 %505  ;;  %v541_v10 = vperm.slane %v535_v7, %v2618_v41  ;;  %v560_v11 = vrot.slane %v545_v2, 4  ;;  %v562_v12 = vrot.slane %v553_v3, 4  ;;  %v565_v14 = vsel %vm510_vm1, 0.0, %v564_v4 }
 0x16c   : > { %v578_v8 = vrot.slane %v506_v5, 4  ;;  %v581_v9 = vsel %vm510_vm1, %v506_v5, %v580_v57  ;;  %v633_v16 = vsel %vm510_vm1, %v564_v4, %v553_v3  ;;  %v638_v17 = vrot.slane %v565_v14, 4 }
 0x16d   : > { %v589_v20 = vperm.slane %v581_v9, %v2606_v23  ;;  %v558_v21 = vrot.slane %v541_v10, 4  ;;  %v561_v22 = vsel %vm510_vm1, 0.0, %v560_v11  ;;  %v563_v24 = vsel %vm510_vm1, 0.0, %v562_v12 }
 0x16e   : > { %v579_v18 = vsel %vm510_vm1, %v578_v8, %v2604_v19  ;;  %v622_v25 = vsel %vm510_vm1, %v560_v11, %v541_v10  ;;  %v627_v28 = vrot.slane %v561_v22, 4  ;;  %v637_v29 = vperm.slane %v633_v16, %v2606_v23 }
 0x16f   : > { %v626_v27 = vperm.slane %v622_v25, %v2606_v23  ;;  %v639_v30 = vsel %vm510_vm1, %v638_v17, %v563_v24  ;;  %v559_v19 = vsel %vm510_vm1, 0.0, %v558_v21  ;;  %v585_v32 = vperm.slane %v579_v18, %v2606_v23 }
 0x170   : > { %v643_v31 = vperm.slane %v639_v30, %v2606_v23  ;;  %v602_v33 = vrot.slane %v589_v20, 4  ;;  %v628_v34 = vsel %vm510_vm1, %v627_v28, %v559_v19  ;;  %v658_v36 = vrot.slane %v637_v29, 4 }
 0x171   : > { %v646_v35 = vrot.slane %v626_v27, 4  ;;  %v566_v37 = vrot.slane %v500_v26, 4  ;;  %v632_v38 = vperm.slane %v628_v34, %v2606_v23  ;;  %v590_v42 = vrot.slane %v585_v32, 4 }
 0x172   : > { %v656_v39 = vrot.slane %v643_v31, 4  ;;  %v569_v43 = vsel %vm510_vm1, %v500_v26, %v568_v44  ;;  %v659_v48 = vsel %vm510_vm1, %v643_v31, %v658_v36  ;;  %v2695_v26 = vpop.permute.xlu0 %743 }
 0x173   : > { %v754_v47 = vpop.permute.xlu1 %753  ;;  %v567_v50 = vsel %vm510_vm1, %v566_v37, %v2597_v13  ;;  %v577_v52 = vperm.slane %v569_v43, %v2606_v23  ;;  %v644_v54 = vrot.slane %v632_v38, 4  ;;  %v647_v55 = vsel %vm510_vm1, %v632_v38, %v646_v35 }
 0x174   : > { %v771_v53 = vrot.slane %v754_v47, 4  ;;  %v657_v56 = vsel %vm510_vm1, %v656_v39, %v637_v29  ;;  %v667_v57 = vperm.slane %v659_v48, %v2618_v41  ;;  %v655_v60 = vperm.slane %v647_v55, %v2618_v41 }
 0x175   : > { %v663_v44 = vperm.slane %v657_v56, %v2618_v41  ;;  %v573_v62 = vperm.slane %v567_v50, %v2606_v23  ;;  %v603_v63 = vsel %vm510_vm1, %v602_v33, %v577_v52  ;;  %v645_v13 = vsel %vm510_vm1, %v644_v54, %v626_v27 }
 0x176   : > { %v672_v0 = vrot.slane %v667_v57, 4  ;;  %v604_v2 = vrot.slane %v577_v52, 4  ;;  %v609_v3 = vperm.slane %v603_v63, %v2618_v41  ;;  %v651_v4 = vperm.slane %v645_v13, %v2618_v41 }
 0x177   : > { %v668_v5 = vrot.slane %v663_v44, 4  ;;  %v674_v7 = vrot.slane %v655_v60, 4  ;;  %v591_v8 = vsel %vm510_vm1, %v590_v42, %v573_v62  ;;  %v592_v10 = vrot.slane %v573_v62, 4 }
 0x178   : > { %v673_v9 = vsel %vm510_vm1, %v672_v0, %v655_v60  ;;  %v597_v11 = vperm.slane %v591_v8, %v2618_v41  ;;  %v605_v12 = vsel %vm510_vm1, %v589_v20, %v604_v2  ;;  %v670_v16 = vrot.slane %v651_v4, 4 }
 0x179   : > { %v669_v14 = vsel %vm510_vm1, %v668_v5, %v651_v4  ;;  %v675_v17 = vsel %vm510_vm1, %v667_v57, %v674_v7  ;;  %735 = vst.msk [vmem:[#allocation2 + $0x20] sm:$0xff] %vm730_vm2, %v673_v9  ;;  %v613_v18 = vperm.slane %v605_v12, %v2618_v41  ;;  %v593_v21 = vsel %vm510_vm1, %v585_v32, %v592_v10 }
 0x17a   : > { %731 = vst.msk [vmem:[#allocation2] sm:$0xff] %vm730_vm2, %v669_v14  ;;  %v614_v22 = vrot.slane %v597_v11, 4  ;;  %v618_v24 = vrot.slane %v609_v3, 4  ;;  %v772_v25 = vsel %vm510_vm1, %v771_v53, %v2602_v15  ;;  %v671_v20 = vsel %vm510_vm1, %v663_v44, %v670_v16 }
 0x17b   : > { %737 = vst.msk [vmem:[#allocation2 + $0x30] sm:$0xff] %vm730_vm2, %v675_v17  ;;  %v601_v27 = vperm.slane %v593_v21, %v2618_v41  ;;  %v620_v28 = vrot.slane %v613_v18, 4  ;;  %v774_v29 = vsel %vm510_vm1, %v754_v47, %v773_v49  ;;  %v778_v31 = vperm.slane %v772_v25, %v2606_v23 }
 0x17c   : > { %733 = vst.msk [vmem:[#allocation2 + $0x10] sm:$0xff] %vm730_vm2, %v671_v20  ;;  %v615_v30 = vsel %vm510_vm1, 0.0, %v614_v22  ;;  %v619_v19 = vsel %vm510_vm1, 0.0, %v618_v24  ;;  %v782_v32 = vperm.slane %v774_v29, %v2606_v23  ;;  %v2714_v15 = vsel %vm510_vm1, %v827_v59, %v2695_v26 }
 0x17d   : > { %v616_v33 = vrot.slane %v601_v27, 4  ;;  %v621_v34 = vsel %vm510_vm1, 0.0, %v620_v28  ;;  %v687_v35 = vsel %vm510_vm1, %v620_v28, %v609_v3  ;;  %v783_v37 = vrot.slane %v778_v31, 4 }
 0x17e   : > { %v691_v49 = vperm.slane %v687_v35, %v2606_v23  ;;  %v692_v36 = vrot.slane %v621_v34, 4  ;;  %v786_v38 = vsel %vm510_vm1, %v778_v31, %v785_v61  ;;  %v795_v47 = vrot.slane %v782_v32, 4 }
 0x17f   : > { %v617_v39 = vsel %vm510_vm1, 0.0, %v616_v33  ;;  %v676_v42 = vsel %vm510_vm1, %v616_v33, %v597_v11  ;;  %v794_v43 = vperm.slane %v786_v38, %v2618_v41  ;;  %v784_v54 = vsel %vm510_vm1, %v783_v37, %v2623_v45 }
 0x180   : > { %v680_v48 = vperm.slane %v676_v42, %v2606_v23  ;;  %v681_v50 = vrot.slane %v617_v39, 4  ;;  %v693_v59 = vsel %vm510_vm1, %v692_v36, %v619_v19  ;;  %v712_v52 = vrot.slane %v691_v49, 4 }
 0x181   : > { %v697_v53 = vperm.slane %v693_v59, %v2606_v23  ;;  %v796_v61 = vsel %vm510_vm1, %v795_v47, %v2616_v40  ;;  %v798_v55 = vsel %vm510_vm1, %v782_v32, %v797_v58  ;;  %v790_v60 = vperm.slane %v784_v54, %v2618_v41 }
 0x182   : > { %v682_v56 = vsel %vm510_vm1, %v681_v50, %v615_v30  ;;  %v700_v57 = vrot.slane %v680_v48, 4  ;;  %v802_v44 = vperm.slane %v796_v61, %v2618_v41  ;;  %v806_v45 = vperm.slane %v798_v55, %v2618_v41 }
 0x183   : > { %v686_v62 = vperm.slane %v682_v56, %v2606_v23  ;;  %v710_v63 = vrot.slane %v697_v53, 4  ;;  %v713_v13 = vsel %vm510_vm1, %v697_v53, %v712_v52  ;;  %v807_v2 = vrot.slane %v790_v60, 4 }
 0x184   : > { %v721_v0 = vperm.slane %v713_v13, %v2618_v41  ;;  %v809_v40 = vrot.slane %v794_v43, 4  ;;  %v811_v3 = vrot.slane %v802_v44, 4  ;;  %v813_v7 = vrot.slane %v806_v45, 4 }
 0x185   : > { %v698_v58 = vrot.slane %v686_v62, 4  ;;  %v701_v4 = vsel %vm510_vm1, %v686_v62, %v700_v57  ;;  %v711_v5 = vsel %vm510_vm1, %v710_v63, %v691_v49  ;;  %v808_v11 = vsel %vm510_vm1, 0.0, %v807_v2 }
 0x186   : > { %v709_v8 = vperm.slane %v701_v4, %v2618_v41  ;;  %v717_v9 = vperm.slane %v711_v5, %v2618_v41  ;;  %v726_v10 = vrot.slane %v721_v0, 4  ;;  %v810_v14 = vsel %vm510_vm1, 0.0, %v809_v40 }
 0x187   : > { %v699_v12 = vsel %vm510_vm1, %v698_v58, %v680_v48  ;;  %v812_v16 = vsel %vm510_vm1, 0.0, %v811_v3  ;;  %v814_v17 = vsel %vm510_vm1, 0.0, %v813_v7  ;;  %v871_v25 = vsel %vm510_vm1, %v809_v40, %v790_v60 }
 0x188   : > { %v705_v18 = vperm.slane %v699_v12, %v2618_v41  ;;  %v722_v21 = vrot.slane %v717_v9, 4  ;;  %v727_v22 = vsel %vm510_vm1, %v726_v10, %v709_v8  ;;  %v728_v24 = vrot.slane %v709_v8, 4 }
 0x189   : > { %736 = vst.msk [vmem:[#allocation2 + $0x28] sm:$0xff] %vm730_vm2, %v727_v22  ;;  %v876_v20 = vrot.slane %v810_v14, 4  ;;  %v882_v27 = vsel %vm510_vm1, %v813_v7, %v802_v44  ;;  %v887_v28 = vrot.slane %v814_v17, 4  ;;  %v875_v31 = vperm.slane %v871_v25, %v2606_v23 }
 0x18a   : > { %v723_v29 = vsel %vm510_vm1, %v722_v21, %v705_v18  ;;  %v724_v30 = vrot.slane %v705_v18, 4  ;;  %v729_v19 = vsel %vm510_vm1, %v721_v0, %v728_v24  ;;  %v886_v33 = vperm.slane %v882_v27, %v2606_v23 }
 0x18b   : > { %732 = vst.msk [vmem:[#allocation2 + $0x8] sm:$0xff] %vm730_vm2, %v723_v29  ;;  %v877_v32 = vsel %vm510_vm1, %v876_v20, %v808_v11  ;;  %v888_v34 = vsel %vm510_vm1, %v887_v28, %v812_v16  ;;  %v829_v35 = vrot.slane %v2695_v26, 4  ;;  %v895_v38 = vrot.slane %v875_v31, 4 }
 0x18c   : > { %v725_v49 = vsel %vm510_vm1, %v717_v9, %v724_v30  ;;  %738 = vst.msk [vmem:[#allocation2 + $0x38] sm:$0xff] %vm730_vm2, %v729_v19  ;;  %v881_v36 = vperm.slane %v877_v32, %v2606_v23  ;;  %v892_v37 = vperm.slane %v888_v34, %v2606_v23  ;;  %v841_v39 = vrot.slane %v2644_v1, 4 }
 0x18d   : > { %734 = vst.msk [vmem:[#allocation2 + $0x18] sm:$0xff] %vm730_vm2, %v725_v49  ;;  %v907_v42 = vrot.slane %v886_v33, 4  ;;  %v830_v43 = vsel %vm510_vm1, %v2625_v46, %v829_v35  ;;  %v834_v26 = vperm.slane %v2714_v15, %v2606_v23 }
 0x18e   : > { %v893_v47 = vrot.slane %v881_v36, 4  ;;  %v896_v48 = vsel %vm510_vm1, %v881_v36, %v895_v38  ;;  %v905_v50 = vrot.slane %v892_v37, 4  ;;  %v838_v59 = vperm.slane %v830_v43, %v2606_v23 }
 0x18f   : > { %v904_v52 = vperm.slane %v896_v48, %v2618_v41  ;;  %v908_v53 = vsel %vm510_vm1, %v892_v37, %v907_v42  ;;  %v839_v54 = vrot.slane %v834_v26, 4  ;;  %v842_v61 = vsel %vm510_vm1, %v834_v26, %v841_v39 }
 0x190   : > { %v894_v55 = vsel %vm510_vm1, %v893_v47, %v875_v31  ;;  %v906_v46 = vsel %vm510_vm1, %v905_v50, %v886_v33  ;;  %v916_v56 = vperm.slane %v908_v53, %v2618_v41  ;;  %v850_v15 = vperm.slane %v842_v61, %v2618_v41 }
 0x191   : > { %v900_v57 = vperm.slane %v894_v55, %v2618_v41  ;;  %v912_v60 = vperm.slane %v906_v46, %v2618_v41  ;;  %v923_v44 = vrot.slane %v904_v52, 4  ;;  %v840_v62 = vsel %vm510_vm1, %v839_v54, %v2644_v1 }
 0x192   : > { %v921_v63 = vrot.slane %v916_v56, 4  ;;  %v846_v13 = vperm.slane %v840_v62, %v2618_v41  ;;  %v851_v45 = vrot.slane %v838_v59, 4  ;;  %v854_v0 = vsel %vm510_vm1, %v838_v59, %v853_v6 }
 0x193   : > { %v917_v2 = vrot.slane %v912_v60, 4  ;;  %v919_v40 = vrot.slane %v900_v57, 4  ;;  %v924_v3 = vsel %vm510_vm1, %v916_v56, %v923_v44  ;;  %v862_v58 = vperm.slane %v854_v0, %v2618_v41 }
 0x194   : > { %v922_v4 = vsel %vm510_vm1, %v921_v63, %v904_v52  ;;  %985 = vst.msk [vmem:[#allocation3 + $0x30] sm:$0xff] %vm730_vm2, %v924_v3  ;;  %v852_v1 = vsel %vm510_vm1, %v851_v45, %v2630_v51  ;;  %v863_v5 = vrot.slane %v846_v13, 4  ;;  %v865_v7 = vrot.slane %v850_v15, 4 }
 0x195   : > { %v918_v8 = vsel %vm510_vm1, %v917_v2, %v900_v57  ;;  %v920_v9 = vsel %vm510_vm1, %v912_v60, %v919_v40  ;;  %983 = vst.msk [vmem:[#allocation3 + $0x20] sm:$0xff] %vm730_vm2, %v922_v4  ;;  %v858_v6 = vperm.slane %v852_v1, %v2618_v41  ;;  %v869_v10 = vrot.slane %v862_v58, 4 }
 0x196   : > { %979 = vst.msk [vmem:[#allocation3] sm:$0xff] %vm730_vm2, %v918_v8  ;;  %v864_v11 = vsel %vm510_vm1, 0.0, %v863_v5  ;;  %v866_v12 = vsel %vm510_vm1, 0.0, %v865_v7  ;;  %v925_v14 = vsel %vm510_vm1, %v865_v7, %v846_v13 }
 0x197   : > { %981 = vst.msk [vmem:[#allocation3 + $0x10] sm:$0xff] %vm730_vm2, %v920_v9  ;;  %v867_v51 = vrot.slane %v858_v6, 4  ;;  %v870_v16 = vsel %vm510_vm1, 0.0, %v869_v10  ;;  %v929_v17 = vperm.slane %v925_v14, %v2606_v23  ;;  %v930_v18 = vrot.slane %v866_v12, 4 }
 0x198   : > { %v936_v21 = vsel %vm510_vm1, %v869_v10, %v858_v6  ;;  %v941_v22 = vrot.slane %v870_v16, 4 }
 0x199   : > { %v868_v24 = vsel %vm510_vm1, 0.0, %v867_v51  ;;  %v931_v25 = vsel %vm510_vm1, %v930_v18, %v864_v11  ;;  %v940_v20 = vperm.slane %v936_v21, %v2606_v23  ;;  %v949_v27 = vrot.slane %v929_v17, 4 }
 0x19a   : > { %v935_v28 = vperm.slane %v931_v25, %v2606_v23  ;;  %v942_v29 = vsel %vm510_vm1, %v941_v22, %v868_v24 }
 0x19b   : > { %v946_v30 = vperm.slane %v942_v29, %v2606_v23  ;;  %v961_v19 = vrot.slane %v940_v20, 4 }
 0x19c   : > { %v947_v31 = vrot.slane %v935_v28, 4  ;;  %v950_v32 = vsel %vm510_vm1, %v935_v28, %v949_v27 }
 0x19d   : > { %v958_v33 = vperm.slane %v950_v32, %v2618_v41  ;;  %v959_v34 = vrot.slane %v946_v30, 4  ;;  %v962_v35 = vsel %vm510_vm1, %v946_v30, %v961_v19 }
 0x19e   : > { %v948_v49 = vsel %vm510_vm1, %v947_v31, %v929_v17  ;;  %v970_v36 = vperm.slane %v962_v35, %v2618_v41 }
 0x19f   : > { %v954_v37 = vperm.slane %v948_v49, %v2618_v41  ;;  %v960_v38 = vsel %vm510_vm1, %v959_v34, %v940_v20  ;;  %v977_v39 = vrot.slane %v958_v33, 4 }
 0x1a0   : > { %v966_v23 = vperm.slane %v960_v38, %v2618_v41  ;;  %v975_v42 = vrot.slane %v970_v36, 4 }
 0x1a1   : > { %v973_v43 = vrot.slane %v954_v37, 4  ;;  %v978_v26 = vsel %vm510_vm1, %v970_v36, %v977_v39 }
 0x1a2   : > { %v971_v47 = vrot.slane %v966_v23, 4  ;;  %v976_v48 = vsel %vm510_vm1, %v975_v42, %v958_v33  ;;  %986 = vst.msk [vmem:[#allocation3 + $0x38] sm:$0xff] %vm730_vm2, %v978_v26 }
 0x1a3   : > { %v974_v50 = vsel %vm510_vm1, %v966_v23, %v973_v43  ;;  %984 = vst.msk [vmem:[#allocation3 + $0x28] sm:$0xff] %vm730_vm2, %v976_v48 }
 0x1a4   : > { %v972_v59 = vsel %vm510_vm1, %v971_v47, %v954_v37  ;;  %982 = vst.msk [vmem:[#allocation3 + $0x18] sm:$0xff] %vm730_vm2, %v974_v50 }
 0x1a5   : > { %980 = vst.msk [vmem:[#allocation3 + $0x8] sm:$0xff] %vm730_vm2, %v972_v59 }
 0x1a6 PF: > { %v991_v41 = vld [vmem:[#allocation9 + $0x18] sm:$0xff]  ;;  %v990_v52 = vld [vmem:[#allocation9 + $0x10] sm:$0xff]  ;;  %v989_v53 = vld [vmem:[#allocation9 + $0x8] sm:$0xff]  ;;  %vm992_vm3 = vcmask 261120   ;;  %s2299_s6 = smov 104   ;;  %s2300_s5 = smov 120  }
 0x1a7   : > { %1008 = vmatpush.msra.mxu0 %v991_v41  ;;  %v988_v54 = vld [vmem:[#allocation9] sm:$0xff]  ;;  %v987_v61 = vld [vmem:[%s2563_s14] sm:$0xff]  ;;  %s2301_s17 = smov 112   ;;  %vm1145_vm4 = vcmask 64512   ;;  %v1144_v15 = vld [vmem:[#allocation2 + $0x38] sm:$0xff]  ;;  %vm1027_vm5 = vcmask 1047556  }
 0x1a8   : > { %v1142_v46 = vld [vmem:[#allocation2 + $0x28] sm:$0xff]  ;;  %v1140_v57 = vld [vmem:[#allocation2 + $0x18] sm:$0xff]  ;;  %v1141_v60 = vld [vmem:[#allocation2 + $0x20] sm:$0xff]  ;;  %v2302_v63 = vmov 1983009808   ;;  %vm1262_vm6 = vcmask 130048  }
 0x1a9   : > { %1009 = vmatpush.msra.mxu0 %v990_v52  ;;  %v1138_v56 = vld [vmem:[#allocation2 + $0x8] sm:$0xff]  ;;  %1763 = vmatpush.xpose.msk.msra.mxu3 %vm1145_vm4, %v1142_v46  ;;  %v1137_v44 = vld [vmem:[#allocation2] sm:$0xff]  ;;  %v1143_v62 = vld [vmem:[#allocation2 + $0x30] sm:$0xff]  ;;  %v1032_v13 = vunpack.c.l.s4 %v2302_v63  ;;  %v2303_v5 = vmov 1934713408   ;;  %s2304_s3 = smov 16  }
 0x1aa   : > { %1757 = vmatpush.xpose.msk.msra.mxu1 %vm1145_vm4, %v1138_v56  ;;  %1760 = vmatpush.xpose.msk.msra.mxu2 %vm1145_vm4, %v1140_v57  ;;  %v1139_v45 = vld [vmem:[#allocation2 + $0x10] sm:$0xff]  ;;  %v1056_v7 = vunpack.c.l.s4 %v2303_v5  ;;  %s2305_s20 = smov 24   ;;  %s2306_s22 = smov 8   ;;  %vm1531_vm7 = vcmask 195584  }
 0x1ab   : > { %1010 = vmatpush.msra.mxu0 %v989_v53  ;;  %v2839_v58 = vunpack.c.0.s8 %v1032_v13  ;;  %s1775_s13 = sshll.u32 %s2274_s8, 1  ;;  %s3053_s14 = sld [smem:[#allocation36_spill]] }
 0x1ac   : > { %v2845_v11 = vunpack.c.0.s8 %v1056_v7  ;;  %s1576_s18 = sadd.s32 %s2270_s30, %s1775_s13  ;;  %s3054_s9 = sld [smem:[#allocation35_spill]] }
 0x1ad   : > { %1011 = vmatpush.msra.mxu0 %v988_v54  ;;  %1764 = vmatpush.xpose.msk.msra.mxu3 %vm1145_vm4, %v1141_v60  ;;  %s1776_s23 = sshll.u32 %s1576_s18, 3  ;;  %s1580_s16 = sshll.u32 %s2590_s4, 4  ;;  %s1581_s16 = int_to_ptr.vmem [resolvable:$true] %s1580_s16 }
 0x1ae   : > { %1756 = vmatmul.msk.f32.vlgmr.msra.gmra.mxu0 %vm992_vm3, %v987_v61  ;;  %1758 = vmatpush.xpose.msk.msra.mxu1 %vm1145_vm4, %v1137_v44  ;;  %s1566_s8 = scalar_lea.sflag [#allocation6], %s2559_s7 }
 0x1af   : > { %1766 = vmatpush.xpose.msk.msrb.mxu0 %vm1145_vm4, %v1144_v15  ;;  %1761 = vmatpush.xpose.msk.msra.mxu2 %vm1145_vm4, %v1139_v45 }
 0x1b1   : > { %s1578_s0 = scalar_lea.hbm %s3053_s14, %s1776_s23 }
 0x1b2   : > { %s1582_s12 = sshll.u32 %s1578_s0, 4  ;;  %s1583_s12 = int_to_ptr.hbm [resolvable:$true] %s1582_s12 }
 0x1b3   : > { %1767 = vmatpush.xpose.msk.msrb.mxu0 %vm1145_vm4, %v1143_v62  ;;  %s2162_s30 = sshra.s32 %s1583_s12, 4  ;;  %s2163_s30 = int_to_ptr.hbm [resolvable:$true] %s2162_s30 }
 0x1b4   : > { %s2164_s2 = scalar_lea.hbm %s2163_s30, 8  ;;  %p2169_p12 = scmp.lt.s32.totalorder %s2163_s30, %s3053_s14 }
 0x1b5   : > { %p2165_p1 = scmp.ne.s32.totalorder %s2163_s30, %s2164_s2 }
 0x1b7   : > { %p2166_p7 = pnand %p2165_p1, %p2516_p13 }
 0x1b9   : > { %p2167_p11 = pneg %p2166_p7 }
 0x22b   : > { %v1013_v55 = vpop.f32.mrf.mxu0 }
 0x22c   : > { %1023 = vrot.lane.b32.xlu1 %v1013_v55, %s2299_s6  ;;  %1017 = vrot.lane.b32.xlu0 %v1013_v55, %s2300_s5  ;;  %v1029_v9 = vrot.slane %v1013_v55, 4  ;;  %s2168_s5 = scalar_lea.hbm %s3053_s14, 32 }
 0x22d   : > { %p2170_p5 = scmp.lt.s32.totalorder %s2168_s5, %s2164_s2 }
 0x22f   : > { %p2171_p6 = por %p2170_p5, %p2169_p12 }
 0x231   : > { %p2172_p9 = pnand %p2171_p6, %p2167_p11 }
 0x234   : > { %1020 = vrot.lane.b32.xlu0 %v1013_v55, %s2301_s17 }
 0x29e   : > { %v1024_v0 = vpop.permute.xlu1 %1023  ;;  %v1018_v2 = vpop.permute.xlu0 %1017 }
 0x29f   : > { %v1039_v40 = vrot.slane %v1024_v0, 4  ;;  %v1041_v3 = vrot.slane %v1018_v2, 4 }
 0x2a1   : > { %v1042_v4 = vsel %vm1027_vm5, %v1024_v0, %v1041_v3  ;;  %v1040_v1 = vsel %vm1027_vm5, %v1039_v40, %v1018_v2 }
 0x2a2   : > { %v1050_v8 = vperm.slane %v1042_v4, %v2839_v58  ;;  %v1046_v6 = vperm.slane %v1040_v1, %v2839_v58 }
 0x2a4   : > { %v1063_v51 = vrot.slane %v1050_v8, 4  ;;  %v1051_v18 = vrot.slane %v1046_v6, 4 }
 0x2a6   : > { %v1021_v10 = vpop.permute.xlu0 %1020 }
 0x2a7   : > { %v1026_v12 = vrot.slane %v1021_v10, 4  ;;  %v1030_v14 = vsel %vm1027_vm5, %v1021_v10, %v1029_v9 }
 0x2a8   : > { %v1038_v16 = vperm.slane %v1030_v14, %v2839_v58 }
 0x2a9   : > { %v1028_v17 = vsel %vm1027_vm5, %v1026_v12, %v1013_v55 }
 0x2aa   : > { %v1034_v21 = vperm.slane %v1028_v17, %v2839_v58  ;;  %v1064_v22 = vsel %vm1027_vm5, %v1063_v51, %v1038_v16  ;;  %v1065_v24 = vrot.slane %v1038_v16, 4 }
 0x2ab   : > { %v1070_v25 = vperm.slane %v1064_v22, %v2845_v11 }
 0x2ac   : > { %v1052_v20 = vsel %vm1027_vm5, %v1051_v18, %v1034_v21  ;;  %v1053_v27 = vrot.slane %v1034_v21, 4  ;;  %v1066_v28 = vsel %vm1027_vm5, %v1050_v8, %v1065_v24 }
 0x2ad   : > { %v1058_v29 = vperm.slane %v1052_v20, %v2845_v11  ;;  %v1074_v30 = vperm.slane %v1066_v28, %v2845_v11  ;;  %v1079_v32 = vrot.slane %v1070_v25, 4 }
 0x2ae   : > { %v1054_v19 = vsel %vm1027_vm5, %v1046_v6, %v1053_v27 }
 0x2af   : > { %v1062_v31 = vperm.slane %v1054_v19, %v2845_v11  ;;  %v1081_v33 = vrot.slane %v1074_v30, 4  ;;  %v1075_v34 = vrot.slane %v1058_v29, 4  ;;  %v1080_v23 = vsel %vm1027_vm5, 0.0, %v1079_v32 }
 0x2b1   : > { %v1077_v35 = vrot.slane %v1062_v31, 4  ;;  %v1082_v49 = vsel %vm1027_vm5, 0.0, %v1081_v33  ;;  %v1094_v36 = vsel %vm1027_vm5, %v1081_v33, %v1070_v25  ;;  %v1076_v50 = vsel %vm1027_vm5, 0.0, %v1075_v34 }
 0x2b2   : > { %v1098_v37 = vperm.slane %v1094_v36, %v2839_v58  ;;  %v1099_v38 = vrot.slane %v1082_v49, 4  ;;  %v1308_v49 = vld [vmem:[#allocation3 + $0x8] sm:$0xff]  ;;  %v1307_v36 = vld [vmem:[#allocation3] sm:$0xff] }
 0x2b3   : > { %v1078_v39 = vsel %vm1027_vm5, 0.0, %v1077_v35  ;;  %v1083_v42 = vsel %vm1027_vm5, %v1077_v35, %v1058_v29  ;;  %1332 = vmatpush.msrb.mxu1 %v1308_v49 }
 0x2b4   : > { %v1100_v43 = vsel %vm1027_vm5, %v1099_v38, %v1080_v23  ;;  %v1087_v26 = vperm.slane %v1083_v42, %v2839_v58  ;;  %v1088_v47 = vrot.slane %v1078_v39, 4  ;;  %v1119_v48 = vrot.slane %v1098_v37, 4  ;;  %v1311_v38 = vld [vmem:[#allocation3 + $0x20] sm:$0xff]  ;;  %v1310_v39 = vld [vmem:[#allocation3 + $0x18] sm:$0xff]  ;;  %v1309_v23 = vld [vmem:[#allocation3 + $0x10] sm:$0xff] }
 0x2b5   : > { %v1104_v59 = vperm.slane %v1100_v43, %v2839_v58  ;;  %1333 = vmatpush.msrb.mxu1 %v1307_v36  ;;  %1355 = vmatpush.msrb.mxu2 %v1310_v39  ;;  %v1314_v42 = vld [vmem:[#allocation3 + $0x38] sm:$0xff] }
 0x2b6   : > { %v1089_v41 = vsel %vm1027_vm5, %v1088_v47, %v1076_v50  ;;  %v1107_v52 = vrot.slane %v1087_v26, 4  ;;  %1401 = vmatpush.msra.mxu0 %v1314_v42 }
 0x2b7   : > { %v1093_v53 = vperm.slane %v1089_v41, %v2839_v58  ;;  %v1120_v54 = vsel %vm1027_vm5, %v1104_v59, %v1119_v48  ;;  %v1117_v61 = vrot.slane %v1104_v59, 4  ;;  %1356 = vmatpush.msrb.mxu2 %v1309_v23 }
 0x2b8   : > { %v1128_v55 = vperm.slane %v1120_v54, %v2845_v11 }
 0x2b9   : > { %v1108_v46 = vsel %vm1027_vm5, %v1093_v53, %v1107_v52  ;;  %v1105_v56 = vrot.slane %v1093_v53, 4  ;;  %v1118_v15 = vsel %vm1027_vm5, %v1117_v61, %v1098_v37  ;;  %v1312_v37 = vld [vmem:[#allocation3 + $0x28] sm:$0xff] }
 0x2ba   : > { %v1116_v57 = vperm.slane %v1108_v46, %v2845_v11  ;;  %v1133_v60 = vrot.slane %v1128_v55, 4  ;;  %v1124_v44 = vperm.slane %v1118_v15, %v2845_v11  ;;  %1378 = vmatpush.msrb.mxu3 %v1312_v37 }
 0x2bb   : > { %v1106_v62 = vsel %vm1027_vm5, %v1105_v56, %v1087_v26  ;;  %v1313_v26 = vld [vmem:[#allocation3 + $0x30] sm:$0xff] }
 0x2bc   : > { %v1134_v63 = vsel %vm1027_vm5, %v1133_v60, %v1116_v57  ;;  %v1112_v13 = vperm.slane %v1106_v62, %v2845_v11  ;;  %v1129_v45 = vrot.slane %v1124_v44, 4  ;;  %v1135_v0 = vrot.slane %v1116_v57, 4  ;;  %1379 = vmatpush.msrb.mxu3 %v1311_v38  ;;  %1402 = vmatpush.msra.mxu0 %v1313_v26 }
 0x2bd   : > { %1765 = vmatmul.msk.f32.vlgmr.msra.gmra.mxu3 %vm1145_vm4, %v1134_v63 }
 0x2be   : > { %v1130_v2 = vsel %vm1027_vm5, %v1129_v45, %v1112_v13  ;;  %v1136_v40 = vsel %vm1027_vm5, %v1128_v55, %v1135_v0  ;;  %v1131_v3 = vrot.slane %v1112_v13, 4 }
 0x2bf   : > { %1759 = vmatmul.msk.f32.vlgmr.msra.gmra.mxu1 %vm1145_vm4, %v1130_v2  ;;  %1768 = vmatmul.msk.f32.vlgmr.msrb.gmra.mxu0 %vm1145_vm4, %v1136_v40 }
 0x2c0   : > { %v1132_v4 = vsel %vm1027_vm5, %v1124_v44, %v1131_v3 }
 0x2c1   : > { %1762 = vmatmul.msk.f32.vlgmr.msra.gmra.mxu2 %vm1145_vm4, %v1132_v4 }
 0x33c   : > { %v1259_v1 = vpop.f32.mrf.mxu0  ;;  %v1172_v10 = vpop.f32.mrf.mxu1 }
 0x33d   : > { %v1272_v5 = vsel %vm1262_vm6, %v1259_v1, -inf  ;;  %v1263_v12 = vsel %vm1262_vm6, %v1172_v10, -inf }
 0x33e   : > { %1273 = vmax.xlane.f32.xlu0 %v1272_v5 }
 0x340   : > { %v1230_v7 = vpop.f32.mrf.mxu3 }
 0x341   : > { %v1269_v8 = vsel %vm1262_vm6, %v1230_v7, -inf }
 0x342   : > { %1270 = vmax.xlane.f32.xlu1 %v1269_v8 }
 0x344   : > { %v1201_v9 = vpop.f32.mrf.mxu2 }
 0x345   : > { %v1266_v6 = vsel %vm1262_vm6, %v1201_v9, -inf }
 0x346   : > { %1267 = vmax.xlane.f32.xlu2 %v1266_v6 }
 0x34e   : > { %1264 = vmax.xlane.f32.xlu2 %v1263_v12 }
 0x3b1   : > { %v1274_v28 = vpop.xlane.xlu0 %1273 }
 0x3b2   : > { %v1278_v30 = vsub.f32 %v1259_v1, %v1274_v28 }
 0x3b4   : > { %v1285_v31 = vmul.f32 1.442695, %v1278_v30 }
 0x3b5   : > { %v1271_v51 = vpop.xlane.xlu1 %1270 }
 0x3b6   : > { %v1277_v18 = vsub.f32 %v1230_v7, %v1271_v51 }
 0x3b8   : > { %v1283_v22 = vmul.f32 1.442695, %v1277_v18 }
 0x3b9   : > { %v1268_v14 = vpop.xlane.xlu2 %1267 }
 0x3ba   : > { %v1276_v25 = vsub.f32 %v1201_v9, %v1268_v14 }
 0x3bc   : > { %v1281_v27 = vmul.f32 1.442695, %v1276_v25 }
 0x3c1   : > { %v1265_v16 = vpop.xlane.xlu2 %1264 }
 0x3c2   : > { %v1275_v17 = vsub.f32 %v1172_v10, %v1265_v16 }
 0x3c4   : > { %v1279_v21 = vmul.f32 1.442695, %v1275_v17 }
 0x3c6   : > { %1952 = vpow2.f32 %v1279_v21 }
 0x3c7   : > { %1954 = vpow2.f32 %v1283_v22 }
 0x3c8   : > { %1956 = vpow2.f32 %v1281_v27 }
 0x3c9   : > { %1958 = vpow2.f32 %v1285_v31 }
 0x3cc   : > { %v1953_v24 = vpop.eup %1952 }
 0x3cd   : > { %v1287_v20 = vsel %vm1262_vm6, %v1953_v24, 0.0  ;;  %v1955_v29 = vpop.eup %1954 }
 0x3ce   : > { %1288 = vadd.xlane.f32.xlu2 %v1287_v20  ;;  %v1293_v19 = vsel %vm1262_vm6, %v1955_v29, 0.0  ;;  %v1957_v32 = vpop.eup %1956 }
 0x3cf   : > { %v1290_v33 = vsel %vm1262_vm6, %v1957_v32, 0.0  ;;  %v1959_v34 = vpop.eup %1958 }
 0x3d0   : > { %v1296_v35 = vsel %vm1262_vm6, %v1959_v34, 0.0 }
 0x3d6   : > { %1294 = vadd.xlane.f32.xlu2 %v1293_v19 }
 0x3de   : > { %1291 = vadd.xlane.f32.xlu2 %v1290_v33 }
 0x3e6   : > { %1297 = vadd.xlane.f32.xlu2 %v1296_v35 }
 0x441   : > { %v1289_v43 = vpop.xlane.xlu2 %1288 }
 0x442   : > { %1960 = vrcp.f32 %v1289_v43 }
 0x448   : > { %v1961_v47 = vpop.eup %1960 }
 0x449   : > { %v1295_v48 = vpop.xlane.xlu2 %1294  ;;  %v1303_v50 = vmul.f32 %v1961_v47, %v1953_v24 }
 0x44a   : > { %1962 = vrcp.f32 %v1295_v48 }
 0x44b   : > { %1769 = vmatmul.msk.f32.vlgmr.msrb.gmra.mxu1 %vm1262_vm6, %v1303_v50 }
 0x450   : > { %v1963_v59 = vpop.eup %1962 }
 0x451   : > { %v1292_v41 = vpop.xlane.xlu2 %1291  ;;  %v1305_v52 = vmul.f32 %v1963_v59, %v1955_v29 }
 0x452   : > { %1964 = vrcp.f32 %v1292_v41 }
 0x453   : > { %1771 = vmatmul.msk.f32.vlgmr.msrb.gmra.mxu3 %vm1262_vm6, %v1305_v52 }
 0x458   : > { %v1965_v53 = vpop.eup %1964 }
 0x459   : > { %v1298_v54 = vpop.xlane.xlu2 %1297  ;;  %v1304_v61 = vmul.f32 %v1965_v53, %v1957_v32 }
 0x45a   : > { %1966 = vrcp.f32 %v1298_v54 }
 0x45b   : > { %1770 = vmatmul.msk.f32.vlgmr.msrb.gmra.mxu2 %vm1262_vm6, %v1304_v61 }
 0x460   : > { %v1967_v55 = vpop.eup %1966 }
 0x461   : > { %v1306_v46 = vmul.f32 %v1967_v55, %v1959_v34 }
 0x463   : > { %1772 = vmatmul.msk.f32.vlgmr.msra.gmra.mxu0 %vm1262_vm6, %v1306_v46 }
 0x4c8   : > { %v1335_v56 = vpop.f32.mrf.mxu1 }
 0x4c9   : > { %v1409_v57 = vrot.slane %v1335_v56, 4 }
 0x4d6   : > { %v1381_v15 = vpop.f32.mrf.mxu3 }
 0x4d7   : > { %v1407_v60 = vrot.slane %v1381_v15, 4  ;;  %v1410_v44 = vsel %vm1027_vm5, %v1381_v15, %v1409_v57 }
 0x4d8   : > { %v1418_v63 = vperm.slane %v1410_v44, %v2839_v58  ;;  %v1535_v44 = vld [vmem:[#allocation13 + $0x10] sm:$0xff] }
 0x4d9   : > { %v1408_v62 = vsel %vm1027_vm5, %v1407_v60, %v1335_v56  ;;  %v1536_v60 = vld [vmem:[#allocation13 + $0x18] sm:$0xff] }
 0x4da   : > { %v1414_v0 = vperm.slane %v1408_v62, %v2839_v58  ;;  %v1445_v4 = vrot.slane %v1418_v63, 4  ;;  %1556 = vmatpush.msra.mxu1 %v1536_v60  ;;  %v1533_v62 = vld [vmem:[#allocation13] sm:$0xff] }
 0x4dc   : > { %v1433_v7 = vrot.slane %v1414_v0, 4  ;;  %1557 = vmatpush.msra.mxu1 %v1535_v44 }
 0x4de   : > { %v1358_v13 = vpop.f32.mrf.mxu2 }
 0x4df   : > { %v1421_v45 = vrot.slane %v1358_v13, 4 }
 0x4e0   : > { %v1404_v2 = vpop.f32.mrf.mxu0 }
 0x4e1   : > { %v1419_v40 = vrot.slane %v1404_v2, 4  ;;  %v1422_v3 = vsel %vm1027_vm5, %v1404_v2, %v1421_v45 }
 0x4e2   : > { %v1430_v1 = vperm.slane %v1422_v3, %v2839_v58  ;;  %v1951_v3 = vld [vmem:[%s3054_s9] ss:$0 sm:$0xff] }
 0x4e3   : > { %v1420_v5 = vsel %vm1027_vm5, %v1419_v40, %v1358_v13 }
 0x4e4   : > { %v1426_v8 = vperm.slane %v1420_v5, %v2839_v58  ;;  %v1443_v9 = vrot.slane %v1430_v1, 4  ;;  %v1446_v6 = vsel %vm1027_vm5, %v1430_v1, %v1445_v4 }
 0x4e5   : > { %v1454_v10 = vperm.slane %v1446_v6, %v2845_v11 }
 0x4e6   : > { %v1431_v12 = vrot.slane %v1426_v8, 4  ;;  %v1434_v14 = vsel %vm1027_vm5, %v1426_v8, %v1433_v7  ;;  %v1444_v51 = vsel %vm1027_vm5, %v1443_v9, %v1418_v63 }
 0x4e7   : > { %v1442_v16 = vperm.slane %v1434_v14, %v2845_v11  ;;  %v1450_v17 = vperm.slane %v1444_v51, %v2845_v11  ;;  %v1461_v18 = vrot.slane %v1454_v10, 4 }
 0x4e8   : > { %v1432_v21 = vsel %vm1027_vm5, %v1431_v12, %v1414_v0 }
 0x4e9   : > { %v1438_v22 = vperm.slane %v1432_v21, %v2845_v11  ;;  %v1457_v24 = vrot.slane %v1442_v16, 4  ;;  %v1459_v25 = vrot.slane %v1450_v17, 4  ;;  %v1462_v20 = vsel %vm1027_vm5, 0.0, %v1461_v18 }
 0x4ea   : > { %v1474_v27 = vsel %vm1027_vm5, %v1461_v18, %v1450_v17  ;;  %v1479_v28 = vrot.slane %v1462_v20, 4 }
 0x4eb   : > { %v1455_v29 = vrot.slane %v1438_v22, 4  ;;  %v1458_v30 = vsel %vm1027_vm5, 0.0, %v1457_v24  ;;  %v1460_v19 = vsel %vm1027_vm5, 0.0, %v1459_v25  ;;  %v1478_v31 = vperm.slane %v1474_v27, %v2839_v58 }
 0x4ec   : > { %v1468_v32 = vrot.slane %v1458_v30, 4  ;;  %v1463_v33 = vsel %vm1027_vm5, %v1457_v24, %v1438_v22  ;;  %v1480_v34 = vsel %vm1027_vm5, %v1479_v28, %v1460_v19 }
 0x4ed   : > { %v1456_v35 = vsel %vm1027_vm5, 0.0, %v1455_v29  ;;  %v1467_v49 = vperm.slane %v1463_v33, %v2839_v58  ;;  %v1484_v36 = vperm.slane %v1480_v34, %v2839_v58  ;;  %v1499_v37 = vrot.slane %v1478_v31, 4 }
 0x4ee   : > { %v1469_v38 = vsel %vm1027_vm5, %v1468_v32, %v1456_v35 }
 0x4ef   : > { %v1473_v39 = vperm.slane %v1469_v38, %v2839_v58  ;;  %v1487_v23 = vrot.slane %v1467_v49, 4  ;;  %v1500_v42 = vsel %vm1027_vm5, %v1484_v36, %v1499_v37  ;;  %v1497_v43 = vrot.slane %v1484_v36, 4 }
 0x4f0   : > { %v1508_v26 = vperm.slane %v1500_v42, %v2845_v11 }
 0x4f1   : > { %v1488_v47 = vsel %vm1027_vm5, %v1473_v39, %v1487_v23  ;;  %v1485_v48 = vrot.slane %v1473_v39, 4  ;;  %v1498_v50 = vsel %vm1027_vm5, %v1497_v43, %v1478_v31 }
 0x4f2   : > { %v1496_v59 = vperm.slane %v1488_v47, %v2845_v11  ;;  %v1513_v41 = vrot.slane %v1508_v26, 4  ;;  %v1504_v52 = vperm.slane %v1498_v50, %v2845_v11 }
 0x4f3   : > { %v1486_v53 = vsel %vm1027_vm5, %v1485_v48, %v1467_v49 }
 0x4f4   : > { %v1514_v58 = vsel %vm1027_vm5, %v1513_v41, %v1496_v59  ;;  %v1515_v54 = vrot.slane %v1496_v59, 4  ;;  %v1492_v61 = vperm.slane %v1486_v53, %v2845_v11  ;;  %v1509_v55 = vrot.slane %v1504_v52, 4  ;;  %v1534_v11 = vld [vmem:[#allocation13 + $0x8] sm:$0xff] }
 0x4f5   : > { %1522 = vrot.lane.b32.xlu1 %v1514_v58, %s2304_s3  ;;  %1558 = vmatpush.msra.mxu1 %v1534_v11 }
 0x4f6   : > { %v1516_v46 = vsel %vm1027_vm5, %v1508_v26, %v1515_v54  ;;  %v1511_v56 = vrot.slane %v1492_v61, 4  ;;  %v1510_v15 = vsel %vm1027_vm5, %v1509_v55, %v1492_v61 }
 0x4f7   : > { %1526 = vrot.lane.b32.xlu0 %v1516_v46, %s2305_s20  ;;  %1559 = vmatpush.msra.mxu1 %v1533_v62 }
 0x4f8   : > { %v1512_v57 = vsel %vm1027_vm5, %v1504_v52, %v1511_v56 }
 0x4f9   : > { %1518 = vrot.lane.b32.xlu2 %v1512_v57, %s2306_s22 }
 0x553   : > { %v1519_v63 = vpop.permute.xlu2 %1518 }
 0x554   : > { %v1529_v13 = vsel %vm1145_vm4, %v1510_v15, %v1519_v63 }
 0x567   : > { %v1523_v45 = vpop.permute.xlu1 %1522 }
 0x568   : > { %v1530_v0 = vsel %vm1262_vm6, %v1529_v13, %v1523_v45 }
 0x569   : > { %v1527_v2 = vpop.permute.xlu0 %1526 }
 0x56a   : > { %v1532_v40 = vsel %vm1531_vm7, %v1530_v0, %v1527_v2 }
 0x56b   : > { %1773 = vmatmul.msk.f32.vlgmr.msra.gmra.mxu1 %vm992_vm3, %v1532_v40 }
 0x5e8   : > { %v1561_v4 = vpop.f32.mrf.mxu1 }
 0x5e9   : > { %v1562_v1 = vadd.f32 %v1951_v3, %v1561_v4 }
 0x5eb   : > { %1564 = vst.msk [vmem:[%s2590_s4] sm:$0xff] %vm992_vm3, %v1562_v1 }
 0x5ec   : > { %2175 = shalt.err (!%p2172_p9)
}
 0x5ed   : > { %1808 = dma.vmem_to_hbm [thread:$0]  (%p2516_p13), %s1581_s16, 128, %s1583_s12, %s1566_s8  }
 0x5ee PF: > { %s3055_s7 = sld [smem:[#allocation22_spill]]  ;;  %p1843_p8 = scmp.ge.s32.totalorder %s2286_s11, 2 }
 0x5f0   : > { %p1831_p2 = pnand %p1843_p8, %p2524_p4 }
 0x5f2   : > { %p1832_p10 = pneg %p1831_p2 }
 0x5f4   : > { %s1594_s20 = sand.u32 1, %s3055_s7  }
 0x5f5   : > { %s1595_s22 = scalar_lea.sflag [#allocation6], %s1594_s20 }
 0x5f6   : > { %2241 = dma.done.wait (%p1832_p10), %s1595_s22, 128  }
 0x5f7   : > { %2243 = vsyncadd (%p1832_p10), %s1595_s22, 4294967168  ;;  %s28_s11 = sadd.s32 1, %s2286_s11   ;;  %s3057_s13 = sld [smem:[#allocation27_spill]] }
 0x5f8   : > { %p25_p0 = scmp.ge.s32.totalorder %s28_s11, 6   ;;  %s3058_s18 = sld [smem:[#allocation23_spill]] }
 0x5f9   : > { %s3059_s29 = sld [smem:[#allocation28_spill]]  ;;  %s3063_s24 = smov %s2250_s25 }
 0x5fa   : > { %s3060_s30 = sld [smem:[#allocation24_spill]]  ;;  %s3064_s25 = smov %s2254_s26 }
 0x5fb   : > { %s3061_s9 = sld [smem:[#allocation25_spill]]  ;;  %s3066_s27 = smov %s2262_s28 }
 0x5fc   : > { %s3062_s23 = sld [smem:[#allocation26_spill]]  ;;  %s3068_s8 = smov %s2282_s10 }
 0x5fd   : > { %s3065_s26 = smov %s3057_s13 }
 0x5fe   : > { %s3067_s28 = smov %s3058_s18  ;;  %27 = sbr.rel (!%p25_p0) target bundleno = 21 (0x15), region = 126 }
 0x602   : > { %s3069_s10 = smov %s3062_s23 }
 0x603   :  { %1601 = vsyncpa [#allocation5], 1 }
 0x604   :  { %1603 = vsyncpa [#allocation5 + $0x1], 1 }
 0x605   :  { %1604 = vsyncpa [#allocation8], 1 }
 0x606   :  { %1606 = vsyncpa [#allocation8 + $0x1], 1 }
 0x607   :  { %1607 = vsyncpa [#allocation11], 1 }
 0x608   :  { %1608 = vsyncpa [#allocation14], 1 }
 0x609   :  { %1609 = vsyncpa [#allocation6], 1 }
 0x60a   :  { %1611 = vsyncpa [#allocation6 + $0x1], 1 }

</bundles_post_ra>
